<compile_context>
chip_gen: v6e
topology: v6e:2x2x1
jax: 0.10.0
libtpu: 0.0.40
codegen_flags: <defaults>
</compile_context>

<pallas_src>
import functools

import jax
import jax.numpy as jnp
from jax.experimental import pallas as pl
from jax.experimental.pallas import tpu as pltpu

F_LEN = 768          # featureLength
D_ATT = 256          # featureInside (MIL attention hidden)
H1, H2, H3 = 256, 128, 2   # fc_target dims


def _layernorm(h, gamma, beta, eps=1e-5):
    mu = jnp.mean(h, axis=-1, keepdims=True)
    var = jnp.mean((h - mu) ** 2, axis=-1, keepdims=True)
    return (h - mu) * jax.lax.rsqrt(var + eps) * gamma + beta


def weibull_kernel(x_ref,                                  # (BC, P, F) bf16
                   lens_ref,                               # (BC, 1) int32
                   wv_ref, bv_ref, ww_ref, bw_ref,         # MIL attention params (bw in SMEM)
                   w1_ref, b1_ref, g1_ref, be1_ref,        # fc_target: Linear(768,256)+LN
                   w2_ref, b2_ref, g2_ref, be2_ref,        # fc_target: Linear(256,128)+LN
                   w3t_ref, b3_ref,                        # fc_target: Linear(128,2) as (2,128) rows + SMEM bias
                   out_ref):                               # (BC, 2) f32
    BC, P, F = x_ref.shape
    x = x_ref[...]                                         # (BC, P, F) bf16 (no f32 copy)
    x2d = x.reshape(BC * P, F)                             # layout-free: P % 16 == 0

    # ---- MILAttention V branch: bf16 MXU matmul, f32 accumulate ----
    v = jnp.tanh(jnp.dot(x2d, wv_ref[...],
                         preferred_element_type=jnp.float32)
                 + bv_ref[...])                            # (BC*P, D_ATT) f32

    # att_u == att_v in the reference (view bug) -> gate = tanh(V)^2.
    # N=1 projection stays off the MXU: VPU multiply + lane reduction, lane-dense result.
    gate = v * v
    att = (jnp.sum(gate.reshape(BC, P, D_ATT) * ww_ref[...].reshape(1, 1, D_ATT),
                   axis=-1)
           + bw_ref[0])                                    # (BC, P) f32

    # ---- masked softmax over the first lengths[b] patches (zeros elsewhere) ----
    lens = lens_ref[...]                                   # (BC, 1) int32
    pidx = jax.lax.broadcasted_iota(jnp.int32, (BC, P), 1)
    mask = pidx < lens
    att_m = jnp.where(mask, att, jnp.float32(-1e30))
    m = jnp.max(att_m, axis=-1, keepdims=True)
    e = jnp.where(mask, jnp.exp(att_m - m), 0.0)
    denom = jnp.maximum(jnp.sum(e, axis=-1, keepdims=True), 1e-30)   # guard len == 0
    w = e * pl.reciprocal(denom, approx=True)              # EUP divide (free VLIW slot)

    # ---- MILNet pooling: attention-weighted sum over patches, f32 accumulate ----
    feat = jnp.sum(w[:, :, None] * x, axis=1, dtype=jnp.float32)     # (BC, F) f32

    # ---- fc_target head: batched (M = BC) matmuls, bf16 in / f32 accumulate ----
    h = jnp.dot(feat.astype(jnp.bfloat16), w1_ref[...],
                preferred_element_type=jnp.float32) + b1_ref[...]
    h = jnp.maximum(h, 0.0)
    h = _layernorm(h, g1_ref[...], be1_ref[...])
    h = jnp.dot(h.astype(jnp.bfloat16), w2_ref[...],
                preferred_element_type=jnp.float32) + b2_ref[...]
    h = jnp.maximum(h, 0.0)
    h = _layernorm(h, g2_ref[...], be2_ref[...])           # (BC, H2) f32

    # ---- final Linear(128, 2) on VPU/XLU: two lane reductions (no N=2 MXU matmul) ----
    l0 = jnp.sum(h * w3t_ref[0:1, :], axis=-1, keepdims=True) + b3_ref[0]   # (BC, 1)
    l1 = jnp.sum(h * w3t_ref[1:2, :], axis=-1, keepdims=True) + b3_ref[1]   # (BC, 1)

    # ---- activate: col0 -> exp, col1 -> softplus (torch threshold=20); no slice/concat ----
    ea = jnp.exp(l0)
    sp = jnp.where(l1 > 20.0, l1,
                   jnp.log1p(jnp.exp(jnp.minimum(l1, 20.0))))
    col = jax.lax.broadcasted_iota(jnp.int32, (BC, H3), 1)
    out_ref[...] = jnp.where(col == 0, ea, sp)


def _hw_config():
    """Best-effort hardware probe: (has_two_tensorcores, vmem_limit_bytes)."""
    two_tc = False
    try:
        kind = jax.devices()[0].device_kind.lower()
        two_tc = ("v7" in kind) or ("v4" in kind)     # megacore chips
    except Exception:
        pass
    vmem_cap = 64 << 20                               # conservative fallback
    try:
        vmem_cap = int(pltpu.get_tpu_info().vmem_capacity_bytes)
    except Exception:
        pass
    vmem_limit = max(32 << 20, min((3 * vmem_cap) // 4, 96 << 20))
    return two_tc, int(vmem_limit)


@functools.partial(jax.jit, static_argnames=("max_rows_per_chunk",))
def weibull_forward(x, lengths, params, *, max_rows_per_chunk=2048):
    x3 = jnp.squeeze(x, axis=0)                            # (B, P, F)  -- x.squeeze(0)
    B, P, F = x3.shape

    two_tc, vmem_limit = _hw_config()

    # bf16 HBM stream for x (dominant traffic). Pad P to the bf16 sublane granule (16)
    # so in-kernel reshapes merging (BC, P) are layout-free; padded patches are masked.
    Pp = ((P + 15) // 16) * 16
    xb = x3.astype(jnp.bfloat16)
    if Pp != P:
        xb = jnp.pad(xb, ((0, 0), (0, Pp - P), (0, 0)))
    lens_i = lengths.astype(jnp.int32)

    # Chunking: cap patch-rows per grid step (VMEM). Force a >=2-way split only on
    # 2-TensorCore chips and only when each half still has >=1024 patch-rows; on
    # single-TC chips the grid is a serial loop and splitting is pure overhead.
    bc_cap = max(1, max_rows_per_chunk // Pp)
    n_chunks = pl.cdiv(B, bc_cap)
    if two_tc and B > 1 and n_chunks < 2 and B * Pp >= 2048:
        n_chunks = 2
    BC = pl.cdiv(B, n_chunks)
    n_chunks = pl.cdiv(B, BC)
    Bp = n_chunks * BC
    if Bp != B:
        xb = jnp.pad(xb, ((0, Bp - B), (0, 0), (0, 0)))
        lens_i = jnp.pad(lens_i, ((0, Bp - B),))
    xc = xb.reshape(n_chunks, BC, Pp, F)
    lc = lens_i.reshape(n_chunks, BC, 1)

    # bf16 copies of the big weight matrices (dominant weight HBM traffic).
    wv = params["wv"].astype(jnp.bfloat16)
    w1 = params["w1"].astype(jnp.bfloat16)
    w2 = params["w2"].astype(jnp.bfloat16)
    w3t = jnp.transpose(params["w3"])          # (2, H2): lane-dense rows for the VPU projection
    b3 = params["b3"].reshape(-1)              # (2,) scalars -> SMEM

    def full(arr):
        # Grid-invariant block covering the whole array. (pipeline_mode=pl.Buffered(1)
        # would shave ~1 MiB of VMEM here; left at the default for compile robustness.)
        nd = arr.ndim
        return pl.BlockSpec(arr.shape, lambda c, _nd=nd: (0,) * _nd)

    def smem():
        return pl.BlockSpec(memory_space=pltpu.MemorySpace.SMEM)

    in_specs = [
        pl.BlockSpec((pl.Squeezed(), BC, Pp, F), lambda c: (c, 0, 0, 0)),   # x chunk (bf16)
        pl.BlockSpec((pl.Squeezed(), BC, 1), lambda c: (c, 0, 0)),          # lengths chunk
        full(wv), full(params["bv"]),
        full(params["ww"]), smem(),                                         # ww row, bw scalar
        full(w1), full(params["b1"]), full(params["g1"]), full(params["be1"]),
        full(w2), full(params["b2"]), full(params["g2"]), full(params["be2"]),
        full(w3t), smem(),                                                  # w3^T rows, b3 scalars
    ]

    flops = int(B * Pp * (2 * F * D_ATT + 3 * D_ATT + 2 * F)
                + B * (2 * F * H1 + 2 * H1 * H2 + 4 * H2 + 10 * (H1 + H2)))
    transcendentals = int(B * Pp * (D_ATT + 1) + 6 * B)
    bytes_accessed = int(B * Pp * F * 2                                     # bf16 x
                         + (F * D_ATT + F * H1 + H1 * H2) * 2               # bf16 weights
                         + (D_ATT * 2 + 4 * H1 + 4 * H2 + 2 * H3 + 3) * 4   # small f32 vectors
                         + B * (H3 + 1) * 4)

    out = pl.pallas_call(
        weibull_kernel,
        out_shape=jax.ShapeDtypeStruct((n_chunks, BC, H3), jnp.float32),
        grid=(n_chunks,),
        in_specs=in_specs,
        out_specs=pl.BlockSpec((pl.Squeezed(), BC, H3), lambda c: (c, 0, 0)),
        compiler_params=pltpu.CompilerParams(
            dimension_semantics=("parallel",),
            vmem_limit_bytes=vmem_limit),
        cost_estimate=pl.CostEstimate(flops=flops,
                                      transcendentals=transcendentals,
                                      bytes_accessed=bytes_accessed),
    )(xc, lc,
      wv, params["bv"], params["ww"], params["bw"],
      w1, params["b1"], params["g1"], params["be1"],
      w2, params["b2"], params["g2"], params["be2"],
      w3t, b3)
    return out.reshape(Bp, H3)[:B]


def init_params(key):
    ks = jax.random.split(key, 10)

    def unif(k, shape, bound):
        return jax.random.uniform(k, shape, jnp.float32, -bound, bound)

    kv = 1.0 / (F_LEN ** 0.5)            # torch Linear default init bound
    ka = 1.0 / (D_ATT ** 0.5)
    xav1 = (6.0 / (F_LEN + H1)) ** 0.5   # xavier_uniform for fc_target[0].weight
    k1 = 1.0 / (F_LEN ** 0.5)
    k2 = 1.0 / (H1 ** 0.5)
    k3 = 1.0 / (H2 ** 0.5)
    return dict(
        # MILAttention: V branch + attention_weights (weight as a (1, D_ATT) row)
        wv=unif(ks[0], (F_LEN, D_ATT), kv), bv=unif(ks[1], (1, D_ATT), kv),
        ww=unif(ks[2], (1, D_ATT), ka),     bw=unif(ks[3], (1,), ka),
        # fc_target
        w1=unif(ks[4], (F_LEN, H1), xav1),  b1=unif(ks[5], (1, H1), k1),
        g1=jnp.ones((1, H1), jnp.float32),  be1=jnp.zeros((1, H1), jnp.float32),
        w2=unif(ks[6], (H1, H2), k2),       b2=unif(ks[7], (1, H2), k2),
        g2=jnp.ones((1, H2), jnp.float32),  be2=jnp.zeros((1, H2), jnp.float32),
        w3=unif(ks[8], (H2, H3), k3),       b3=unif(ks[9], (1, H3), k3),
    )


if __name__ == "__main__":
    key = jax.random.PRNGKey(0)
    kp, kx = jax.random.split(key)
    params = init_params(kp)

    B, P = 2, 8
    x = jax.random.normal(kx, (1, B, P, F_LEN), jnp.float32)   # (1, B, P, 768)
    lengths = jnp.array([8, 5], dtype=jnp.int32)                # nonpad lengths per bag

    out = weibull_forward(x, lengths, params)
    jax.block_until_ready(out)
    assert out.shape == (B, 2) and bool(jnp.all(jnp.isfinite(out)))
    print("KERNEL_OK")
</pallas_src>

<mosaic_0001>
module attributes {stable_mosaic.version = 11 : i64} {
  func.func @weibull_kernel(%arg0: i32, %arg1: memref<1x2x16x768xbf16, #tpu.memory_space<vmem>>, %arg2: memref<1x2x1xi32, #tpu.memory_space<vmem>>, %arg3: memref<768x256xbf16, #tpu.memory_space<vmem>>, %arg4: memref<1x256xf32, #tpu.memory_space<vmem>>, %arg5: memref<1x256xf32, #tpu.memory_space<vmem>>, %arg6: memref<1xf32, #tpu.memory_space<smem>>, %arg7: memref<768x256xbf16, #tpu.memory_space<vmem>>, %arg8: memref<1x256xf32, #tpu.memory_space<vmem>>, %arg9: memref<1x256xf32, #tpu.memory_space<vmem>>, %arg10: memref<1x256xf32, #tpu.memory_space<vmem>>, %arg11: memref<256x128xbf16, #tpu.memory_space<vmem>>, %arg12: memref<1x128xf32, #tpu.memory_space<vmem>>, %arg13: memref<1x128xf32, #tpu.memory_space<vmem>>, %arg14: memref<1x128xf32, #tpu.memory_space<vmem>>, %arg15: memref<2x128xf32, #tpu.memory_space<vmem>>, %arg16: memref<2xf32, #tpu.memory_space<smem>>, %arg17: memref<1x2x2xf32, #tpu.memory_space<vmem>>) attributes {dimension_semantics = [#tpu.dimension_semantics<parallel>], iteration_bounds = array<i64: 1>, scalar_prefetch = 0 : i64, scratch_operands = 0 : i64, tpu.core_type = #tpu.core_type<tc>, window_params = [{transform_indices = @transform_0, window_bounds = array<i64: 1, 2, 16, 768>}, {transform_indices = @transform_1, window_bounds = array<i64: 1, 2, 1>}, {pipeline_mode = #tpu.pipeline_mode<synchronous>, transform_indices = @transform_2, window_bounds = array<i64: 768, 256>}, {pipeline_mode = #tpu.pipeline_mode<synchronous>, transform_indices = @transform_3, window_bounds = array<i64: 1, 256>}, {pipeline_mode = #tpu.pipeline_mode<synchronous>, transform_indices = @transform_4, window_bounds = array<i64: 1, 256>}, {transform_indices = @transform_5, window_bounds = array<i64: 1>}, {pipeline_mode = #tpu.pipeline_mode<synchronous>, transform_indices = @transform_6, window_bounds = array<i64: 768, 256>}, {pipeline_mode = #tpu.pipeline_mode<synchronous>, transform_indices = @transform_7, window_bounds = array<i64: 1, 256>}, {pipeline_mode = #tpu.pipeline_mode<synchronous>, transform_indices = @transform_8, window_bounds = array<i64: 1, 256>}, {pipeline_mode = #tpu.pipeline_mode<synchronous>, transform_indices = @transform_9, window_bounds = array<i64: 1, 256>}, {pipeline_mode = #tpu.pipeline_mode<synchronous>, transform_indices = @transform_10, window_bounds = array<i64: 256, 128>}, {pipeline_mode = #tpu.pipeline_mode<synchronous>, transform_indices = @transform_11, window_bounds = array<i64: 1, 128>}, {pipeline_mode = #tpu.pipeline_mode<synchronous>, transform_indices = @transform_12, window_bounds = array<i64: 1, 128>}, {pipeline_mode = #tpu.pipeline_mode<synchronous>, transform_indices = @transform_13, window_bounds = array<i64: 1, 128>}, {pipeline_mode = #tpu.pipeline_mode<synchronous>, transform_indices = @transform_14, window_bounds = array<i64: 2, 128>}, {transform_indices = @transform_15, window_bounds = array<i64: 2>}, {transform_indices = @transform_16, window_bounds = array<i64: 1, 2, 2>}]} {
    %c0 = arith.constant 0 : index
    %c0_0 = arith.constant 0 : index
    %c0_1 = arith.constant 0 : index
    %c0_2 = arith.constant 0 : index
    %0 = vector.load %arg1[%c0, %c0_0, %c0_1, %c0_2] : memref<1x2x16x768xbf16, #tpu.memory_space<vmem>>, vector<1x2x16x768xbf16>
    %1 = vector.shape_cast %0 : vector<1x2x16x768xbf16> to vector<2x16x768xbf16>
    %2 = vector.shape_cast %1 : vector<2x16x768xbf16> to vector<32x768xbf16>
    %c0_3 = arith.constant 0 : index
    %c0_4 = arith.constant 0 : index
    %3 = vector.load %arg3[%c0_3, %c0_4] : memref<768x256xbf16, #tpu.memory_space<vmem>>, vector<768x256xbf16>
    %cst = arith.constant dense<0.000000e+00> : vector<32x256xf32>
    %4 = tpu.matmul %2, %3, %cst {dimension_numbers = #tpu.dot_dimension_numbers<[1], [0], [0], [1], [0, 0, 1, 1], [], []>} : vector<32x768xbf16>, vector<768x256xbf16>, vector<32x256xf32> -> vector<32x256xf32>
    %c0_5 = arith.constant 0 : index
    %c0_6 = arith.constant 0 : index
    %5 = vector.load %arg4[%c0_5, %c0_6] : memref<1x256xf32, #tpu.memory_space<vmem>>, vector<1x256xf32>
    %6 = vector.broadcast %5 : vector<1x256xf32> to vector<32x256xf32>
    %7 = arith.addf %4, %6 : vector<32x256xf32>
    %8 = math.tanh %7 : vector<32x256xf32>
    %9 = arith.mulf %8, %8 : vector<32x256xf32>
    %10 = vector.shape_cast %9 : vector<32x256xf32> to vector<2x16x256xf32>
    %c0_7 = arith.constant 0 : index
    %c0_8 = arith.constant 0 : index
    %11 = vector.load %arg5[%c0_7, %c0_8] : memref<1x256xf32, #tpu.memory_space<vmem>>, vector<1x256xf32>
    %12 = vector.shape_cast %11 : vector<1x256xf32> to vector<1x1x256xf32>
    %13 = vector.broadcast %12 : vector<1x1x256xf32> to vector<2x16x256xf32>
    %14 = arith.mulf %10, %13 : vector<2x16x256xf32>
    %cst_9 = arith.constant dense<0.000000e+00> : vector<2x16xf32>
    %15 = vector.multi_reduction <add>, %14, %cst_9 [2] : vector<2x16x256xf32> to vector<2x16xf32>
    %c0_10 = arith.constant 0 : index
    %16 = memref.load %arg6[%c0_10] : memref<1xf32, #tpu.memory_space<smem>>
    %17 = vector.broadcast %16 : f32 to vector<2x16xf32>
    %18 = arith.addf %15, %17 : vector<2x16xf32>
    %c0_11 = arith.constant 0 : index
    %c0_12 = arith.constant 0 : index
    %c0_13 = arith.constant 0 : index
    %19 = vector.load %arg2[%c0_11, %c0_12, %c0_13] : memref<1x2x1xi32, #tpu.memory_space<vmem>>, vector<1x2x1xi32>
    %20 = vector.shape_cast %19 : vector<1x2x1xi32> to vector<2x1xi32>
    %21 = tpu.iota {dimensions = array<i32: 1>} : vector<2x16xi32>
    %22 = vector.broadcast %20 : vector<2x1xi32> to vector<2x16xi32>
    %23 = arith.cmpi slt, %21, %22 : vector<2x16xi32>
    %cst_14 = arith.constant -1.000000e+30 : f32
    %24 = vector.broadcast %cst_14 : f32 to vector<2x16xf32>
    %25 = arith.select %23, %18, %24 : vector<2x16xi1>, vector<2x16xf32>
    %cst_15 = arith.constant dense<0xFF800000> : vector<2xf32>
    %26 = vector.multi_reduction <maximumf>, %25, %cst_15 [1] : vector<2x16xf32> to vector<2xf32>
    %27 = vector.shape_cast %26 : vector<2xf32> to vector<2x1xf32>
    %28 = vector.broadcast %27 : vector<2x1xf32> to vector<2x16xf32>
    %29 = arith.subf %25, %28 : vector<2x16xf32>
    %30 = math.exp %29 : vector<2x16xf32>
    %cst_16 = arith.constant 0.000000e+00 : f32
    %31 = vector.broadcast %cst_16 : f32 to vector<2x16xf32>
    %32 = arith.select %23, %30, %31 : vector<2x16xi1>, vector<2x16xf32>
    %cst_17 = arith.constant dense<0.000000e+00> : vector<2xf32>
    %33 = vector.multi_reduction <add>, %32, %cst_17 [1] : vector<2x16xf32> to vector<2xf32>
    %34 = vector.shape_cast %33 : vector<2xf32> to vector<2x1xf32>
    %cst_18 = arith.constant 1.000000e-30 : f32
    %35 = vector.broadcast %cst_18 : f32 to vector<2x1xf32>
    %36 = arith.maximumf %34, %35 : vector<2x1xf32>
    %37 = tpu.reciprocal %36 {approx = true} : vector<2x1xf32> -> vector<2x1xf32>
    %38 = vector.broadcast %37 : vector<2x1xf32> to vector<2x16xf32>
    %39 = arith.mulf %32, %38 : vector<2x16xf32>
    %40 = vector.shape_cast %39 : vector<2x16xf32> to vector<2x16x1xf32>
    %41 = arith.extf %1 : vector<2x16x768xbf16> to vector<2x16x768xf32>
    %42 = vector.broadcast %40 : vector<2x16x1xf32> to vector<2x16x768xf32>
    %43 = arith.mulf %42, %41 : vector<2x16x768xf32>
    %cst_19 = arith.constant dense<0.000000e+00> : vector<2x768xf32>
    %44 = vector.multi_reduction <add>, %43, %cst_19 [1] : vector<2x16x768xf32> to vector<2x768xf32>
    %45 = arith.truncf %44 : vector<2x768xf32> to vector<2x768xbf16>
    %c0_20 = arith.constant 0 : index
    %c0_21 = arith.constant 0 : index
    %46 = vector.load %arg7[%c0_20, %c0_21] : memref<768x256xbf16, #tpu.memory_space<vmem>>, vector<768x256xbf16>
    %cst_22 = arith.constant dense<0.000000e+00> : vector<2x256xf32>
    %47 = tpu.matmul %45, %46, %cst_22 {dimension_numbers = #tpu.dot_dimension_numbers<[1], [0], [0], [1], [0, 0, 1, 1], [], []>} : vector<2x768xbf16>, vector<768x256xbf16>, vector<2x256xf32> -> vector<2x256xf32>
    %c0_23 = arith.constant 0 : index
    %c0_24 = arith.constant 0 : index
    %48 = vector.load %arg8[%c0_23, %c0_24] : memref<1x256xf32, #tpu.memory_space<vmem>>, vector<1x256xf32>
    %49 = vector.broadcast %48 : vector<1x256xf32> to vector<2x256xf32>
    %50 = arith.addf %47, %49 : vector<2x256xf32>
    %cst_25 = arith.constant 0.000000e+00 : f32
    %51 = vector.broadcast %cst_25 : f32 to vector<2x256xf32>
    %52 = arith.maximumf %50, %51 : vector<2x256xf32>
    %c0_26 = arith.constant 0 : index
    %c0_27 = arith.constant 0 : index
    %53 = vector.load %arg9[%c0_26, %c0_27] : memref<1x256xf32, #tpu.memory_space<vmem>>, vector<1x256xf32>
    %c0_28 = arith.constant 0 : index
    %c0_29 = arith.constant 0 : index
    %54 = vector.load %arg10[%c0_28, %c0_29] : memref<1x256xf32, #tpu.memory_space<vmem>>, vector<1x256xf32>
    %cst_30 = arith.constant dense<0.000000e+00> : vector<2xf32>
    %55 = vector.multi_reduction <add>, %52, %cst_30 [1] : vector<2x256xf32> to vector<2xf32>
    %56 = vector.shape_cast %55 : vector<2xf32> to vector<2x1xf32>
    %cst_31 = arith.constant 2.560000e+02 : f32
    %57 = vector.broadcast %cst_31 : f32 to vector<2x1xf32>
    %58 = arith.divf %56, %57 : vector<2x1xf32>
    %59 = vector.broadcast %58 : vector<2x1xf32> to vector<2x256xf32>
    %60 = arith.subf %52, %59 : vector<2x256xf32>
    %61 = arith.mulf %60, %60 : vector<2x256xf32>
    %cst_32 = arith.constant dense<0.000000e+00> : vector<2xf32>
    %62 = vector.multi_reduction <add>, %61, %cst_32 [1] : vector<2x256xf32> to vector<2xf32>
    %63 = vector.shape_cast %62 : vector<2xf32> to vector<2x1xf32>
    %cst_33 = arith.constant 2.560000e+02 : f32
    %64 = vector.broadcast %cst_33 : f32 to vector<2x1xf32>
    %65 = arith.divf %63, %64 : vector<2x1xf32>
    %66 = vector.broadcast %58 : vector<2x1xf32> to vector<2x256xf32>
    %67 = arith.subf %52, %66 : vector<2x256xf32>
    %cst_34 = arith.constant 9.99999974E-6 : f32
    %68 = vector.broadcast %cst_34 : f32 to vector<2x1xf32>
    %69 = arith.addf %65, %68 : vector<2x1xf32>
    %70 = math.rsqrt %69 : vector<2x1xf32>
    %71 = vector.broadcast %70 : vector<2x1xf32> to vector<2x256xf32>
    %72 = arith.mulf %67, %71 : vector<2x256xf32>
    %73 = vector.broadcast %53 : vector<1x256xf32> to vector<2x256xf32>
    %74 = arith.mulf %72, %73 : vector<2x256xf32>
    %75 = vector.broadcast %54 : vector<1x256xf32> to vector<2x256xf32>
    %76 = arith.addf %74, %75 : vector<2x256xf32>
    %77 = arith.truncf %76 : vector<2x256xf32> to vector<2x256xbf16>
    %c0_35 = arith.constant 0 : index
    %c0_36 = arith.constant 0 : index
    %78 = vector.load %arg11[%c0_35, %c0_36] : memref<256x128xbf16, #tpu.memory_space<vmem>>, vector<256x128xbf16>
    %cst_37 = arith.constant dense<0.000000e+00> : vector<2x128xf32>
    %79 = tpu.matmul %77, %78, %cst_37 {dimension_numbers = #tpu.dot_dimension_numbers<[1], [0], [0], [1], [0, 0, 1, 1], [], []>} : vector<2x256xbf16>, vector<256x128xbf16>, vector<2x128xf32> -> vector<2x128xf32>
    %c0_38 = arith.constant 0 : index
    %c0_39 = arith.constant 0 : index
    %80 = vector.load %arg12[%c0_38, %c0_39] : memref<1x128xf32, #tpu.memory_space<vmem>>, vector<1x128xf32>
    %81 = vector.broadcast %80 : vector<1x128xf32> to vector<2x128xf32>
    %82 = arith.addf %79, %81 : vector<2x128xf32>
    %cst_40 = arith.constant 0.000000e+00 : f32
    %83 = vector.broadcast %cst_40 : f32 to vector<2x128xf32>
    %84 = arith.maximumf %82, %83 : vector<2x128xf32>
    %c0_41 = arith.constant 0 : index
    %c0_42 = arith.constant 0 : index
    %85 = vector.load %arg13[%c0_41, %c0_42] : memref<1x128xf32, #tpu.memory_space<vmem>>, vector<1x128xf32>
    %c0_43 = arith.constant 0 : index
    %c0_44 = arith.constant 0 : index
    %86 = vector.load %arg14[%c0_43, %c0_44] : memref<1x128xf32, #tpu.memory_space<vmem>>, vector<1x128xf32>
    %cst_45 = arith.constant dense<0.000000e+00> : vector<2xf32>
    %87 = vector.multi_reduction <add>, %84, %cst_45 [1] : vector<2x128xf32> to vector<2xf32>
    %88 = vector.shape_cast %87 : vector<2xf32> to vector<2x1xf32>
    %cst_46 = arith.constant 1.280000e+02 : f32
    %89 = vector.broadcast %cst_46 : f32 to vector<2x1xf32>
    %90 = arith.divf %88, %89 : vector<2x1xf32>
    %91 = vector.broadcast %90 : vector<2x1xf32> to vector<2x128xf32>
    %92 = arith.subf %84, %91 : vector<2x128xf32>
    %93 = arith.mulf %92, %92 : vector<2x128xf32>
    %cst_47 = arith.constant dense<0.000000e+00> : vector<2xf32>
    %94 = vector.multi_reduction <add>, %93, %cst_47 [1] : vector<2x128xf32> to vector<2xf32>
    %95 = vector.shape_cast %94 : vector<2xf32> to vector<2x1xf32>
    %cst_48 = arith.constant 1.280000e+02 : f32
    %96 = vector.broadcast %cst_48 : f32 to vector<2x1xf32>
    %97 = arith.divf %95, %96 : vector<2x1xf32>
    %98 = vector.broadcast %90 : vector<2x1xf32> to vector<2x128xf32>
    %99 = arith.subf %84, %98 : vector<2x128xf32>
    %cst_49 = arith.constant 9.99999974E-6 : f32
    %100 = vector.broadcast %cst_49 : f32 to vector<2x1xf32>
    %101 = arith.addf %97, %100 : vector<2x1xf32>
    %102 = math.rsqrt %101 : vector<2x1xf32>
    %103 = vector.broadcast %102 : vector<2x1xf32> to vector<2x128xf32>
    %104 = arith.mulf %99, %103 : vector<2x128xf32>
    %105 = vector.broadcast %85 : vector<1x128xf32> to vector<2x128xf32>
    %106 = arith.mulf %104, %105 : vector<2x128xf32>
    %107 = vector.broadcast %86 : vector<1x128xf32> to vector<2x128xf32>
    %108 = arith.addf %106, %107 : vector<2x128xf32>
    %c0_50 = arith.constant 0 : index
    %c0_51 = arith.constant 0 : index
    %109 = vector.load %arg15[%c0_50, %c0_51] : memref<2x128xf32, #tpu.memory_space<vmem>>, vector<1x128xf32>
    %110 = vector.broadcast %109 : vector<1x128xf32> to vector<2x128xf32>
    %111 = arith.mulf %108, %110 : vector<2x128xf32>
    %cst_52 = arith.constant dense<0.000000e+00> : vector<2xf32>
    %112 = vector.multi_reduction <add>, %111, %cst_52 [1] : vector<2x128xf32> to vector<2xf32>
    %113 = vector.shape_cast %112 : vector<2xf32> to vector<2x1xf32>
    %c0_53 = arith.constant 0 : index
    %114 = memref.load %arg16[%c0_53] : memref<2xf32, #tpu.memory_space<smem>>
    %115 = vector.broadcast %114 : f32 to vector<2x1xf32>
    %116 = arith.addf %113, %115 : vector<2x1xf32>
    %c1 = arith.constant 1 : index
    %c0_54 = arith.constant 0 : index
    %117 = vector.load %arg15[%c1, %c0_54] : memref<2x128xf32, #tpu.memory_space<vmem>>, vector<1x128xf32>
    %118 = vector.broadcast %117 : vector<1x128xf32> to vector<2x128xf32>
    %119 = arith.mulf %108, %118 : vector<2x128xf32>
    %cst_55 = arith.constant dense<0.000000e+00> : vector<2xf32>
    %120 = vector.multi_reduction <add>, %119, %cst_55 [1] : vector<2x128xf32> to vector<2xf32>
    %121 = vector.shape_cast %120 : vector<2xf32> to vector<2x1xf32>
    %c1_56 = arith.constant 1 : index
    %122 = memref.load %arg16[%c1_56] : memref<2xf32, #tpu.memory_space<smem>>
    %123 = vector.broadcast %122 : f32 to vector<2x1xf32>
    %124 = arith.addf %121, %123 : vector<2x1xf32>
    %125 = math.exp %116 : vector<2x1xf32>
    %cst_57 = arith.constant 2.000000e+01 : f32
    %126 = vector.broadcast %cst_57 : f32 to vector<2x1xf32>
    %127 = arith.cmpf ogt, %124, %126 : vector<2x1xf32>
    %cst_58 = arith.constant 2.000000e+01 : f32
    %128 = vector.broadcast %cst_58 : f32 to vector<2x1xf32>
    %129 = arith.minimumf %124, %128 : vector<2x1xf32>
    %130 = math.exp %129 : vector<2x1xf32>
    %131 = math.log1p %130 : vector<2x1xf32>
    %132 = arith.select %127, %124, %131 : vector<2x1xi1>, vector<2x1xf32>
    %133 = tpu.iota {dimensions = array<i32: 1>} : vector<2x2xi32>
    %c0_i32 = arith.constant 0 : i32
    %134 = vector.broadcast %c0_i32 : i32 to vector<2x2xi32>
    %135 = arith.cmpi eq, %133, %134 : vector<2x2xi32>
    %136 = vector.shape_cast %125 : vector<2x1xf32> to vector<2x1xf32>
    %137 = vector.broadcast %136 : vector<2x1xf32> to vector<2x2xf32>
    %138 = vector.shape_cast %132 : vector<2x1xf32> to vector<2x1xf32>
    %139 = vector.broadcast %138 : vector<2x1xf32> to vector<2x2xf32>
    %140 = arith.select %135, %137, %139 : vector<2x2xi1>, vector<2x2xf32>
    %c0_59 = arith.constant 0 : index
    %c0_60 = arith.constant 0 : index
    %c0_61 = arith.constant 0 : index
    %141 = vector.load %arg17[%c0_59, %c0_60, %c0_61] : memref<1x2x2xf32, #tpu.memory_space<vmem>>, vector<1x2x2xf32>
    %142 = vector.shape_cast %141 : vector<1x2x2xf32> to vector<2x2xf32>
    %143 = vector.shape_cast %140 : vector<2x2xf32> to vector<1x2x2xf32>
    tpu.vector_store %arg17[%c0_59, %c0_60, %c0_61], %143 {strides = array<i32>} : memref<1x2x2xf32, #tpu.memory_space<vmem>>, vector<1x2x2xf32>,
    return
  }
  func.func @transform_0(%arg0: i32) -> (i32, i32, i32, i32) {
    %c0_i32 = arith.constant 0 : i32
    %c0_i32_0 = arith.constant 0 : i32
    %c0_i32_1 = arith.constant 0 : i32
    %c0_i32_2 = arith.constant 0 : i32
    return %arg0, %c0_i32, %c0_i32_0, %c0_i32_1 : i32, i32, i32, i32
  }
  func.func @transform_1(%arg0: i32) -> (i32, i32, i32) {
    %c0_i32 = arith.constant 0 : i32
    %c0_i32_0 = arith.constant 0 : i32
    %c0_i32_1 = arith.constant 0 : i32
    return %arg0, %c0_i32, %c0_i32_0 : i32, i32, i32
  }
  func.func @transform_2(%arg0: i32) -> (i32, i32) {
    %c0_i32 = arith.constant 0 : i32
    %c0_i32_0 = arith.constant 0 : i32
    %c0_i32_1 = arith.constant 0 : i32
    return %c0_i32, %c0_i32_0 : i32, i32
  }
  func.func @transform_3(%arg0: i32) -> (i32, i32) {
    %c0_i32 = arith.constant 0 : i32
    %c0_i32_0 = arith.constant 0 : i32
    %c0_i32_1 = arith.constant 0 : i32
    return %c0_i32, %c0_i32_0 : i32, i32
  }
  func.func @transform_4(%arg0: i32) -> (i32, i32) {
    %c0_i32 = arith.constant 0 : i32
    %c0_i32_0 = arith.constant 0 : i32
    %c0_i32_1 = arith.constant 0 : i32
    return %c0_i32, %c0_i32_0 : i32, i32
  }
  func.func @transform_5(%arg0: i32) -> i32 {
    %c0_i32 = arith.constant 0 : i32
    %c0_i32_0 = arith.constant 0 : i32
    return %c0_i32 : i32
  }
  func.func @transform_6(%arg0: i32) -> (i32, i32) {
    %c0_i32 = arith.constant 0 : i32
    %c0_i32_0 = arith.constant 0 : i32
    %c0_i32_1 = arith.constant 0 : i32
    return %c0_i32, %c0_i32_0 : i32, i32
  }
  func.func @transform_7(%arg0: i32) -> (i32, i32) {
    %c0_i32 = arith.constant 0 : i32
    %c0_i32_0 = arith.constant 0 : i32
    %c0_i32_1 = arith.constant 0 : i32
    return %c0_i32, %c0_i32_0 : i32, i32
  }
  func.func @transform_8(%arg0: i32) -> (i32, i32) {
    %c0_i32 = arith.constant 0 : i32
    %c0_i32_0 = arith.constant 0 : i32
    %c0_i32_1 = arith.constant 0 : i32
    return %c0_i32, %c0_i32_0 : i32, i32
  }
  func.func @transform_9(%arg0: i32) -> (i32, i32) {
    %c0_i32 = arith.constant 0 : i32
    %c0_i32_0 = arith.constant 0 : i32
    %c0_i32_1 = arith.constant 0 : i32
    return %c0_i32, %c0_i32_0 : i32, i32
  }
  func.func @transform_10(%arg0: i32) -> (i32, i32) {
    %c0_i32 = arith.constant 0 : i32
    %c0_i32_0 = arith.constant 0 : i32
    %c0_i32_1 = arith.constant 0 : i32
    return %c0_i32, %c0_i32_0 : i32, i32
  }
  func.func @transform_11(%arg0: i32) -> (i32, i32) {
    %c0_i32 = arith.constant 0 : i32
    %c0_i32_0 = arith.constant 0 : i32
    %c0_i32_1 = arith.constant 0 : i32
    return %c0_i32, %c0_i32_0 : i32, i32
  }
  func.func @transform_12(%arg0: i32) -> (i32, i32) {
    %c0_i32 = arith.constant 0 : i32
    %c0_i32_0 = arith.constant 0 : i32
    %c0_i32_1 = arith.constant 0 : i32
    return %c0_i32, %c0_i32_0 : i32, i32
  }
  func.func @transform_13(%arg0: i32) -> (i32, i32) {
    %c0_i32 = arith.constant 0 : i32
    %c0_i32_0 = arith.constant 0 : i32
    %c0_i32_1 = arith.constant 0 : i32
    return %c0_i32, %c0_i32_0 : i32, i32
  }
  func.func @transform_14(%arg0: i32) -> (i32, i32) {
    %c0_i32 = arith.constant 0 : i32
    %c0_i32_0 = arith.constant 0 : i32
    %c0_i32_1 = arith.constant 0 : i32
    return %c0_i32, %c0_i32_0 : i32, i32
  }
  func.func @transform_15(%arg0: i32) -> i32 {
    %c0_i32 = arith.constant 0 : i32
    %c0_i32_0 = arith.constant 0 : i32
    return %c0_i32 : i32
  }
  func.func @transform_16(%arg0: i32) -> (i32, i32, i32) {
    %c0_i32 = arith.constant 0 : i32
    %c0_i32_0 = arith.constant 0 : i32
    %c0_i32_1 = arith.constant 0 : i32
    return %arg0, %c0_i32, %c0_i32_0 : i32, i32, i32
  }
}

</mosaic_0001>

<bundles_post_ra>
// kernel: weibull_forward.1
= control target key start
LH: loop header
LB: loop body
LE: loop exit
PB: predicated region body
PF: predicated region fallthrough
CT: control target
= control target key end

     0   :  { %s3770_s0 = inlined_call_operand.vmem [shape: bf16[1,2,16,768], index: 0, kind: input, shape index: {}]   ;;  %s3771_s1 = inlined_call_operand.vmem [shape: s32[1,2,1], index: 1, kind: input, shape index: {}]   ;;  %s3772_s2 = inlined_call_operand.vmem [shape: bf16[768,256], index: 2, kind: input, shape index: {}]   ;;  %s3773_s3 = inlined_call_operand.vmem [shape: f32[1,256], index: 3, kind: input, shape index: {}]   ;;  %s3774_s4 = inlined_call_operand.vmem [shape: f32[1,256], index: 4, kind: input, shape index: {}]   ;;  %s3775_s5 = inlined_call_operand.<no memory space> [shape: f32[1], index: 5, kind: input, shape index: {}]   ;;  %s3776_s6 = inlined_call_operand.vmem [shape: bf16[768,256], index: 6, kind: input, shape index: {}]   ;;  %s3777_s7 = inlined_call_operand.vmem [shape: f32[1,256], index: 7, kind: input, shape index: {}]   ;;  %s3778_s8 = inlined_call_operand.vmem [shape: f32[1,256], index: 8, kind: input, shape index: {}]   ;;  %s3779_s9 = inlined_call_operand.vmem [shape: f32[1,256], index: 9, kind: input, shape index: {}]   ;;  %s3780_s10 = inlined_call_operand.vmem [shape: bf16[256,128], index: 10, kind: input, shape index: {}]   ;;  %s3781_s11 = inlined_call_operand.vmem [shape: f32[1,128], index: 11, kind: input, shape index: {}]   ;;  %s3782_s12 = inlined_call_operand.vmem [shape: f32[1,128], index: 12, kind: input, shape index: {}]   ;;  %s3783_s13 = inlined_call_operand.vmem [shape: f32[1,128], index: 13, kind: input, shape index: {}]   ;;  %s3784_s14 = inlined_call_operand.vmem [shape: f32[2,128], index: 14, kind: input, shape index: {}]   ;;  %s3785_s15 = inlined_call_operand.vmem [shape: f32[2], index: 15, kind: input, shape index: {}]   ;;  %s3786_s16 = inlined_call_operand.hbm [shape: f32[1,2,2], index: 16, kind: output, shape index: {}]  }
   0x1   :  { %3788 = sst [smem:[#allocation9_spill]] %s3770_s0 }
   0x2   :  { %22 = vsyncpa [#allocation5], 0 }
   0x3   :  { %23 = vsyncpa [#allocation4], 0  ;;  %s60_s23 = sshll.u32 %s3785_s15, 4  ;;  %s61_s23 = int_to_ptr.vmem [resolvable:$true] %s60_s23 }
   0x4   :  { %s2835_s24 = scalar_lea.vmem %s61_s23, 16  ;;  %p2840_p1 = scmp.lt.s32.totalorder %s61_s23, %s61_s23 }
   0x5   :  { %p2836_p0 = scmp.ne.s32.totalorder %s61_s23, %s2835_s24  ;;  %p2841_p2 = scmp.lt.s32.totalorder %s2835_s24, %s2835_s24 }
   0x7   :  { %p2842_p3 = por %p2841_p2, %p2840_p1 }
   0x9   :  { %p2843_p4 = pnand %p2842_p3, %p2836_p0 }
   0xb   :  { %2846 = shalt.err (!%p2843_p4)
}
   0xc   :  { %s2871_s25 = smov [#allocation3]  }
   0xd   :  { %63 = dma.vmem_to_smem %s61_s23, 16, %s2871_s25, [#allocation5]  }
   0xe   :  { %2867 = dma.done.wait [#allocation5], 16  }
   0xf   :  { %2868 = vsyncadd [#allocation5], 4294967280 }
  0x10   :  { %67 = sfence }
  0x11   :  { %v2481_v0 = vld [vmem:[%s3772_s2 + $0x74] ss:$8 sps:$4 sm:$0xff]   ;;  %v2483_v1 = vld [vmem:[%s3772_s2 + $0x70] ss:$8 sps:$4 sm:$0xff]   ;;  %v2487_v4 = vld [vmem:[%s3772_s2 + $0x64] ss:$8 sps:$4 sm:$0xff]  }
  0x12   :  { %729 = vmatprep.subr.bf16.mxu0 %v2481_v0  ;;  %v2484_v2 = vld [vmem:[%s3772_s2 + $0x174] ss:$8 sps:$4 sm:$0xff]   ;;  %v2486_v3 = vld [vmem:[%s3772_s2 + $0x170] ss:$8 sps:$4 sm:$0xff]   ;;  %v2489_v5 = vld [vmem:[%s3772_s2 + $0x60] ss:$8 sps:$4 sm:$0xff]  }
  0x13   :  { %730 = vmatpush1.bf16.msra.mxu0 %v2483_v1  ;;  %782 = vmatprep.subr.bf16.mxu1 %v2484_v2  ;;  %v2490_v6 = vld [vmem:[%s3772_s2 + $0x164] ss:$8 sps:$4 sm:$0xff]   ;;  %v2492_v7 = vld [vmem:[%s3772_s2 + $0x160] ss:$8 sps:$4 sm:$0xff]   ;;  %v2493_v8 = vld [vmem:[%s3772_s2 + $0x54] ss:$8 sps:$4 sm:$0xff]  }
  0x14   :  { %783 = vmatpush1.bf16.msra.mxu1 %v2486_v3  ;;  %731 = vmatprep.subr.bf16.mxu0 %v2487_v4  ;;  %v2495_v9 = vld [vmem:[%s3772_s2 + $0x50] ss:$8 sps:$4 sm:$0xff]   ;;  %v2496_v10 = vld [vmem:[%s3772_s2 + $0x154] ss:$8 sps:$4 sm:$0xff]   ;;  %v2499_v11 = vld [vmem:[%s3772_s2 + $0x44] ss:$8 sps:$4 sm:$0xff]  }
  0x15   :  { %784 = vmatprep.subr.bf16.mxu1 %v2490_v6  ;;  %v2498_v12 = vld [vmem:[%s3772_s2 + $0x150] ss:$8 sps:$4 sm:$0xff]   ;;  %v2502_v13 = vld [vmem:[%s3772_s2 + $0x144] ss:$8 sps:$4 sm:$0xff]   ;;  %v2501_v14 = vld [vmem:[%s3772_s2 + $0x40] ss:$8 sps:$4 sm:$0xff]  }
  0x16   :  { %v2505_v15 = vld [vmem:[%s3772_s2 + $0x34] ss:$8 sps:$4 sm:$0xff]   ;;  %v2504_v16 = vld [vmem:[%s3772_s2 + $0x140] ss:$8 sps:$4 sm:$0xff]   ;;  %v2507_v18 = vld [vmem:[%s3772_s2 + $0x30] ss:$8 sps:$4 sm:$0xff]  }
  0x17   :  { %732 = vmatpush1.bf16.msra.mxu0 %v2489_v5  ;;  %v2508_v17 = vld [vmem:[%s3772_s2 + $0x134] ss:$8 sps:$4 sm:$0xff]   ;;  %v2511_v19 = vld [vmem:[%s3772_s2 + $0x24] ss:$8 sps:$4 sm:$0xff]   ;;  %v2510_v20 = vld [vmem:[%s3772_s2 + $0x130] ss:$8 sps:$4 sm:$0xff]  }
  0x18   :  { %733 = vmatprep.subr.bf16.mxu0 %v2493_v8  ;;  %785 = vmatpush1.bf16.msra.mxu1 %v2492_v7  ;;  %v2514_v21 = vld [vmem:[%s3772_s2 + $0x124] ss:$8 sps:$4 sm:$0xff]   ;;  %v2513_v22 = vld [vmem:[%s3772_s2 + $0x20] ss:$8 sps:$4 sm:$0xff]   ;;  %v2517_v23 = vld [vmem:[%s3772_s2 + $0x14] ss:$8 sps:$4 sm:$0xff]  }
  0x19   :  { %786 = vmatprep.subr.bf16.mxu1 %v2496_v10  ;;  %v2516_v24 = vld [vmem:[%s3772_s2 + $0x120] ss:$8 sps:$4 sm:$0xff]   ;;  %v2520_v25 = vld [vmem:[%s3772_s2 + $0x114] ss:$8 sps:$4 sm:$0xff]   ;;  %v2519_v26 = vld [vmem:[%s3772_s2 + $0x10] ss:$8 sps:$4 sm:$0xff]  }
  0x1a   :  { %v2523_v27 = vld [vmem:[%s3772_s2 + $0x4] ss:$8 sps:$4 sm:$0xff]   ;;  %v2522_v28 = vld [vmem:[%s3772_s2 + $0x110] ss:$8 sps:$4 sm:$0xff]   ;;  %v2525_v30 = vld [vmem:[%s3772_s2] ss:$8 sps:$4 sm:$0xff]  }
  0x1b   :  { %734 = vmatpush1.bf16.msra.mxu0 %v2495_v9  ;;  %v2526_v29 = vld [vmem:[%s3772_s2 + $0x104] ss:$8 sps:$4 sm:$0xff]   ;;  %v2529_v31 = vld [vmem:[%s3772_s2 + $0xf4] ss:$8 sps:$4 sm:$0xff]   ;;  %v2528_v32 = vld [vmem:[%s3772_s2 + $0x100] ss:$8 sps:$4 sm:$0xff]  }
  0x1c   :  { %735 = vmatprep.subr.bf16.mxu0 %v2499_v11  ;;  %787 = vmatpush1.bf16.msra.mxu1 %v2498_v12  ;;  %v2532_v33 = vld [vmem:[%s3772_s2 + $0x1f4] ss:$8 sps:$4 sm:$0xff]   ;;  %v2531_v34 = vld [vmem:[%s3772_s2 + $0xf0] ss:$8 sps:$4 sm:$0xff]   ;;  %v2535_v35 = vld [vmem:[%s3772_s2 + $0xe4] ss:$8 sps:$4 sm:$0xff]  }
  0x1d   :  { %788 = vmatprep.subr.bf16.mxu1 %v2502_v13  ;;  %v2534_v36 = vld [vmem:[%s3772_s2 + $0x1f0] ss:$8 sps:$4 sm:$0xff]   ;;  %v2538_v37 = vld [vmem:[%s3772_s2 + $0x1e4] ss:$8 sps:$4 sm:$0xff]   ;;  %v2537_v38 = vld [vmem:[%s3772_s2 + $0xe0] ss:$8 sps:$4 sm:$0xff]  }
  0x1e   :  { %v2541_v39 = vld [vmem:[%s3772_s2 + $0xd4] ss:$8 sps:$4 sm:$0xff]   ;;  %v2540_v40 = vld [vmem:[%s3772_s2 + $0x1e0] ss:$8 sps:$4 sm:$0xff]   ;;  %v2543_v42 = vld [vmem:[%s3772_s2 + $0xd0] ss:$8 sps:$4 sm:$0xff]  }
  0x1f   :  { %736 = vmatpush1.bf16.msra.mxu0 %v2501_v14  ;;  %v2544_v41 = vld [vmem:[%s3772_s2 + $0x1d4] ss:$8 sps:$4 sm:$0xff]   ;;  %v2547_v43 = vld [vmem:[%s3772_s2 + $0xc4] ss:$8 sps:$4 sm:$0xff]   ;;  %v2546_v44 = vld [vmem:[%s3772_s2 + $0x1d0] ss:$8 sps:$4 sm:$0xff]  }
  0x20   :  { %737 = vmatprep.subr.bf16.mxu0 %v2505_v15  ;;  %789 = vmatpush1.bf16.msra.mxu1 %v2504_v16  ;;  %v2550_v45 = vld [vmem:[%s3772_s2 + $0x1c4] ss:$8 sps:$4 sm:$0xff]   ;;  %s3789_s24 = sld [smem:[#allocation9_spill]]  ;;  %v2549_v48 = vld [vmem:[%s3772_s2 + $0xc0] ss:$8 sps:$4 sm:$0xff]   ;;  %vm962_vm0 = vcmask 130112  }
  0x21   :  { %790 = vmatprep.subr.bf16.mxu1 %v2508_v17  ;;  %v2552_v50 = vld [vmem:[%s3772_s2 + $0x1c0] ss:$8 sps:$4 sm:$0xff]   ;;  %v2553_v51 = vld [vmem:[%s3772_s2 + $0xb4] ss:$8 sps:$4 sm:$0xff]   ;;  %v2555_v56 = vld [vmem:[%s3772_s2 + $0xb0] ss:$8 sps:$4 sm:$0xff]  }
  0x22   :  { %v2556_v54 = vld [vmem:[%s3772_s2 + $0x1b4] ss:$8 sps:$4 sm:$0xff]   ;;  %v2559_v57 = vld [vmem:[%s3772_s2 + $0xa4] ss:$8 sps:$4 sm:$0xff]   ;;  %v2558_v58 = vld [vmem:[%s3772_s2 + $0x1b0] ss:$8 sps:$4 sm:$0xff]  }
  0x23   :  { %738 = vmatpush1.bf16.msra.mxu0 %v2507_v18  ;;  %v2562_v59 = vld [vmem:[%s3772_s2 + $0x1a4] ss:$8 sps:$4 sm:$0xff]   ;;  %v2561_v60 = vld [vmem:[%s3772_s2 + $0xa0] ss:$8 sps:$4 sm:$0xff]   ;;  %v2565_v61 = vld [vmem:[%s3772_s2 + $0x94] ss:$8 sps:$4 sm:$0xff]  }
  0x24   :  { %739 = vmatprep.subr.bf16.mxu0 %v2511_v19  ;;  %791 = vmatpush1.bf16.msra.mxu1 %v2510_v20  ;;  %v2564_v62 = vld [vmem:[%s3772_s2 + $0x1a0] ss:$8 sps:$4 sm:$0xff]   ;;  %v2568_v63 = vld [vmem:[%s3772_s2 + $0x194] ss:$8 sps:$4 sm:$0xff]   ;;  %v2567_v0 = vld [vmem:[%s3772_s2 + $0x90] ss:$8 sps:$4 sm:$0xff]  }
  0x25   :  { %792 = vmatprep.subr.bf16.mxu1 %v2514_v21  ;;  %v2571_v1 = vld [vmem:[%s3772_s2 + $0x84] ss:$8 sps:$4 sm:$0xff]   ;;  %v2570_v2 = vld [vmem:[%s3772_s2 + $0x190] ss:$8 sps:$4 sm:$0xff]   ;;  %v2573_v4 = vld [vmem:[%s3772_s2 + $0x80] ss:$8 sps:$4 sm:$0xff]  }
  0x26   :  { %v69_v46 = vld [vmem:[%s3789_s24] sm:$0xff]  ;;  %v72_v47 = vld [vmem:[%s3789_s24 + $0x18] sm:$0xff]  ;;  %v70_v52 = vld [vmem:[%s3789_s24 + $0x8] sm:$0xff]  ;;  %vm973_vm1 = vcmask 1041409   ;;  %vm977_vm3 = vcmask 123904   ;;  %vm1914_vm4 = vcmask 1041408  }
  0x27   :  { %740 = vmatpush1.bf16.msra.mxu0 %v2513_v22  ;;  %v2230_v49 = vcombine.high %v69_v46, %v72_v47  ;;  %v73_v53 = vld [vmem:[%s3789_s24 + $0x20] sm:$0xff]  ;;  %v2581_v5 = vld [vmem:[%s3772_s2 + $0x274] ss:$8 sps:$4 sm:$0xff]   ;;  %v78_v8 = vld [vmem:[%s3789_s24 + $0x48] sm:$0xff]  ;;  %v2229_v9 = vcombine.low %v69_v46, %v72_v47  ;;  %vm2212_vm8 = vcmask 9216  }
  0x28   :  { %741 = vmatprep.subr.bf16.mxu0 %v2517_v23  ;;  %793 = vmatpush1.bf16.msra.mxu1 %v2516_v24  ;;  %v2232_v55 = vcombine.high %v70_v52, %v73_v53  ;;  %v2574_v3 = vld [vmem:[%s3772_s2 + $0x184] ss:$8 sps:$4 sm:$0xff]   ;;  %v2577_v6 = vld [vmem:[%s3772_s2 + $0x180] ss:$8 sps:$4 sm:$0xff]   ;;  %v75_v7 = vld [vmem:[%s3789_s24 + $0x30] sm:$0xff]  ;;  %v2231_v14 = vcombine.low %v70_v52, %v73_v53 }
  0x29   :  { %794 = vmatprep.subr.bf16.mxu1 %v2520_v25  ;;  %761 = vmatprep.mubr.bf16.mxu0 %v2230_v49  ;;  %v76_v10 = vld [vmem:[%s3789_s24 + $0x38] sm:$0xff]  ;;  %v79_v11 = vld [vmem:[%s3789_s24 + $0x50] sm:$0xff]  ;;  %v2236_v13 = vcombine.high %v75_v7, %v78_v8  ;;  %v2586_v15 = vld [vmem:[%s3772_s2 + $0x264] ss:$8 sps:$4 sm:$0xff]   ;;  %v2235_v23 = vcombine.low %v75_v7, %v78_v8 }
  0x2a   :  { %814 = vmatprep.mubr.bf16.mxu1 %v2232_v55  ;;  %v2579_v12 = vld [vmem:[%s3772_s2 + $0x270] ss:$8 sps:$4 sm:$0xff]   ;;  %v2238_v16 = vcombine.high %v76_v10, %v79_v11  ;;  %v2584_v17 = vld [vmem:[%s3772_s2 + $0x260] ss:$8 sps:$4 sm:$0xff]   ;;  %v2589_v18 = vld [vmem:[%s3772_s2 + $0x254] ss:$8 sps:$4 sm:$0xff]   ;;  %v2237_v25 = vcombine.low %v76_v10, %v79_v11 }
  0x2b   :  { %742 = vmatpush1.bf16.msra.mxu0 %v2519_v26  ;;  %v3196_v19 = vld [vmem:[%s3789_s24 + $0x10] sm:$0xff]  ;;  %v3201_v20 = vld [vmem:[%s3789_s24 + $0x28] sm:$0xff]  ;;  %v3294_v52 = vld [vmem:[%s3789_s24 + $0x58] sm:$0xff] }
  0x2c   :  { %743 = vmatprep.subr.bf16.mxu0 %v2523_v27  ;;  %795 = vmatpush1.bf16.msra.mxu1 %v2522_v28  ;;  %v2587_v21 = vld [vmem:[%s3772_s2 + $0x250] ss:$8 sps:$4 sm:$0xff]   ;;  %v2592_v22 = vld [vmem:[%s3772_s2 + $0x244] ss:$8 sps:$4 sm:$0xff]   ;;  %v2234_v24 = vcombine.high %v3196_v19, %v3201_v20  ;;  %v2590_v26 = vld [vmem:[%s3772_s2 + $0x240] ss:$8 sps:$4 sm:$0xff]   ;;  %v2233_v53 = vcombine.low %v3196_v19, %v3201_v20 }
  0x2d   :  { %796 = vmatprep.subr.bf16.mxu1 %v2526_v29  ;;  %v2595_v27 = vld [vmem:[%s3772_s2 + $0x234] ss:$8 sps:$4 sm:$0xff]   ;;  %v2593_v28 = vld [vmem:[%s3772_s2 + $0x230] ss:$8 sps:$4 sm:$0xff]   ;;  %v2598_v29 = vld [vmem:[%s3772_s2 + $0x224] ss:$8 sps:$4 sm:$0xff]  }
  0x2e   :  { %v2624_v46 = vld [vmem:[%s3772_s2 + $0x2a0] ss:$8 sps:$4 sm:$0xff]   ;;  %v2629_v47 = vld [vmem:[%s3772_s2 + $0x294] ss:$8 sps:$4 sm:$0xff]   ;;  %v2632_v49 = vld [vmem:[%s3772_s2 + $0x284] ss:$8 sps:$4 sm:$0xff]  }
  0x2f   :  { %744 = vmatpush1.bf16.msra.mxu0 %v2525_v30  ;;  %v2596_v30 = vld [vmem:[%s3772_s2 + $0x220] ss:$8 sps:$4 sm:$0xff]  }
  0x30   :  { %745 = vmatprep.subr.bf16.mxu0 %v2529_v31  ;;  %797 = vmatpush1.bf16.msra.mxu1 %v2528_v32  ;;  %v2601_v31 = vld [vmem:[%s3772_s2 + $0x214] ss:$8 sps:$4 sm:$0xff]   ;;  %v2599_v32 = vld [vmem:[%s3772_s2 + $0x210] ss:$8 sps:$4 sm:$0xff]  }
  0x31   :  { %798 = vmatprep.subr.bf16.mxu1 %v2532_v33  ;;  %v2604_v33 = vld [vmem:[%s3772_s2 + $0x204] ss:$8 sps:$4 sm:$0xff]  }
  0x33   :  { %746 = vmatpush2.bf16.msra.mxu0 %v2531_v34  ;;  %v2602_v34 = vld [vmem:[%s3772_s2 + $0x200] ss:$8 sps:$4 sm:$0xff]  }
  0x34   :  { %747 = vmatprep.subr.bf16.mxu0 %v2535_v35  ;;  %799 = vmatpush2.bf16.msra.mxu1 %v2534_v36  ;;  %v2607_v35 = vld [vmem:[%s3772_s2 + $0x2f4] ss:$8 sps:$4 sm:$0xff]   ;;  %v2605_v36 = vld [vmem:[%s3772_s2 + $0x2f0] ss:$8 sps:$4 sm:$0xff]  }
  0x35   :  { %800 = vmatprep.subr.bf16.mxu1 %v2538_v37  ;;  %v2610_v37 = vld [vmem:[%s3772_s2 + $0x2e4] ss:$8 sps:$4 sm:$0xff]  }
  0x37   :  { %748 = vmatpush2.bf16.msra.mxu0 %v2537_v38  ;;  %v2608_v38 = vld [vmem:[%s3772_s2 + $0x2e0] ss:$8 sps:$4 sm:$0xff]  }
  0x38   :  { %749 = vmatprep.subr.bf16.mxu0 %v2541_v39  ;;  %801 = vmatpush2.bf16.msra.mxu1 %v2540_v40  ;;  %v2613_v39 = vld [vmem:[%s3772_s2 + $0x2d4] ss:$8 sps:$4 sm:$0xff]   ;;  %v2611_v40 = vld [vmem:[%s3772_s2 + $0x2d0] ss:$8 sps:$4 sm:$0xff]  }
  0x39   :  { %802 = vmatprep.subr.bf16.mxu1 %v2544_v41  ;;  %v2616_v41 = vld [vmem:[%s3772_s2 + $0x2c4] ss:$8 sps:$4 sm:$0xff]  }
  0x3b   :  { %750 = vmatpush2.bf16.msra.mxu0 %v2543_v42  ;;  %v2614_v42 = vld [vmem:[%s3772_s2 + $0x2c0] ss:$8 sps:$4 sm:$0xff]  }
  0x3c   :  { %751 = vmatprep.subr.bf16.mxu0 %v2547_v43  ;;  %803 = vmatpush2.bf16.msra.mxu1 %v2546_v44  ;;  %v2619_v43 = vld [vmem:[%s3772_s2 + $0x2b4] ss:$8 sps:$4 sm:$0xff]   ;;  %v2617_v44 = vld [vmem:[%s3772_s2 + $0x2b0] ss:$8 sps:$4 sm:$0xff]  }
  0x3d   :  { %804 = vmatprep.subr.bf16.mxu1 %v2550_v45  ;;  %v2626_v45 = vld [vmem:[%s3772_s2 + $0x2a4] ss:$8 sps:$4 sm:$0xff]  }
  0x3f   :  { %752 = vmatpush2.bf16.msra.mxu0 %v2549_v48  ;;  %v2627_v48 = vld [vmem:[%s3772_s2 + $0x290] ss:$8 sps:$4 sm:$0xff]  }
  0x40   :  { %753 = vmatprep.subr.bf16.mxu0 %v2553_v51  ;;  %805 = vmatpush2.bf16.msra.mxu1 %v2552_v50  ;;  %v2630_v50 = vld [vmem:[%s3772_s2 + $0x280] ss:$8 sps:$4 sm:$0xff]  }
  0x41   :  { %806 = vmatprep.subr.bf16.mxu1 %v2556_v54  ;;  %v3289_v51 = vld [vmem:[%s3789_s24 + $0x40] sm:$0xff] }
  0x42   :  { %v2240_v54 = vcombine.high %v3289_v51, %v3294_v52  ;;  %v2239_v55 = vcombine.low %v3289_v51, %v3294_v52 }
  0x43   :  { %754 = vmatpush2.bf16.msra.mxu0 %v2555_v56  ;;  %v2872_v56 = vmov 0  }
  0x44   :  { %755 = vmatprep.subr.bf16.mxu0 %v2559_v57  ;;  %807 = vmatpush2.bf16.msra.mxu1 %v2558_v58 }
  0x45   :  { %808 = vmatprep.subr.bf16.mxu1 %v2562_v59  ;;  %2480 = vset.pattern.permute.xlu0 %v2872_v56  ;;  %v179_v59 = vlaneseq }
  0x47   :  { %756 = vmatpush2.bf16.msra.mxu0 %v2561_v60 }
  0x48   :  { %757 = vmatprep.subr.bf16.mxu0 %v2565_v61  ;;  %809 = vmatpush2.bf16.msra.mxu1 %v2564_v62  ;;  %v3303_v61 = vshrl.u32 %v179_v59, 7 }
  0x49   :  { %810 = vmatprep.subr.bf16.mxu1 %v2568_v63 }
  0x4b   :  { %758 = vmatpush2.bf16.msra.mxu0 %v2567_v0 }
  0x4c   :  { %759 = vmatprep.subr.bf16.mxu0 %v2571_v1  ;;  %811 = vmatpush2.bf16.msra.mxu1 %v2570_v2  ;;  %v3306_v1 = vsub.s32 0, %v3303_v61  ;;  %v177_v2 = vld [vmem:[%s3773_s3] sm:$0x3] }
  0x4d   :  { %812 = vmatprep.subr.bf16.mxu1 %v2574_v3 }
  0x4f   :  { %760 = vmatpush2.bf16.msra.mxu0 %v2573_v4  ;;  %v3312_v4 = vsub.s32 1, %v3303_v61 }
  0x50   :  { %835 = vmatprep.subr.bf16.mxu0 %v2581_v5  ;;  %813 = vmatpush2.bf16.msra.mxu1 %v2577_v6  ;;  %v182_v6 = vrot.slane %v177_v2, %v3306_v1 }
  0x51   :  { %v186_v8 = vrot.slane %v177_v2, %v3312_v4 }
  0x52   :  { %762 = vmatmul.mubr.bf16.vlgmr.msra.gmra.mxu0 %v2229_v9 }
  0x53   :  { %836 = vmatpush1.bf16.msra.mxu0 %v2579_v12  ;;  %771 = vmatprep.mubr.bf16.mxu0 %v2236_v13 }
  0x54   :  { %815 = vmatmul.mubr.bf16.vlgmr.msra.gmra.mxu1 %v2231_v14  ;;  %837 = vmatprep.subr.bf16.mxu0 %v2586_v15 }
  0x55   :  { %824 = vmatprep.mubr.bf16.mxu1 %v2238_v16 }
  0x57   :  { %838 = vmatpush1.bf16.msra.mxu0 %v2584_v17 }
  0x58   :  { %839 = vmatprep.subr.bf16.mxu0 %v2589_v18 }
  0x5a   :  { %772 = vmatmul.mubr.bf16.gmra.mxu0 %v2235_v23 }
  0x5b   :  { %840 = vmatpush1.bf16.msra.mxu0 %v2587_v21  ;;  %867 = vmatprep.mubr.bf16.mxu0 %v2234_v24 }
  0x5c   :  { %841 = vmatprep.subr.bf16.mxu0 %v2592_v22  ;;  %825 = vmatmul.mubr.bf16.gmra.mxu1 %v2237_v25 }
  0x5f   :  { %842 = vmatpush1.bf16.msra.mxu0 %v2590_v26 }
  0x60   :  { %843 = vmatprep.subr.bf16.mxu0 %v2595_v27 }
  0x63   :  { %844 = vmatpush1.bf16.msra.mxu0 %v2593_v28 }
  0x64   :  { %845 = vmatprep.subr.bf16.mxu0 %v2598_v29 }
  0x67   :  { %846 = vmatpush1.bf16.msra.mxu0 %v2596_v30 }
  0x68   :  { %847 = vmatprep.subr.bf16.mxu0 %v2601_v31 }
  0x6b   :  { %848 = vmatpush1.bf16.msra.mxu0 %v2599_v32 }
  0x6c   :  { %849 = vmatprep.subr.bf16.mxu0 %v2604_v33 }
  0x6f   :  { %850 = vmatpush1.bf16.msra.mxu0 %v2602_v34 }
  0x70   :  { %851 = vmatprep.subr.bf16.mxu0 %v2607_v35 }
  0x73   :  { %852 = vmatpush2.bf16.msra.mxu0 %v2605_v36 }
  0x74   :  { %853 = vmatprep.subr.bf16.mxu0 %v2610_v37 }
  0x77   :  { %854 = vmatpush2.bf16.msra.mxu0 %v2608_v38 }
  0x78   :  { %855 = vmatprep.subr.bf16.mxu0 %v2613_v39 }
  0x7b   :  { %856 = vmatpush2.bf16.msra.mxu0 %v2611_v40 }
  0x7c   :  { %857 = vmatprep.subr.bf16.mxu0 %v2616_v41 }
  0x7f   :  { %858 = vmatpush2.bf16.msra.mxu0 %v2614_v42 }
  0x80   :  { %859 = vmatprep.subr.bf16.mxu0 %v2619_v43 }
  0x83   :  { %860 = vmatpush2.bf16.msra.mxu0 %v2617_v44 }
  0x84   :  { %861 = vmatprep.subr.bf16.mxu0 %v2626_v45 }
  0x87   :  { %862 = vmatpush2.bf16.msra.mxu0 %v2624_v46 }
  0x88   :  { %863 = vmatprep.subr.bf16.mxu0 %v2629_v47 }
  0x8b   :  { %864 = vmatpush2.bf16.msra.mxu0 %v2627_v48 }
  0x8c   :  { %865 = vmatprep.subr.bf16.mxu0 %v2632_v49  ;;  %v904_v49 = vld [vmem:[%s3774_s4] sm:$0x3] }
  0x8d   :  { %v913_v56 = vrot.slane %v904_v49, %v3312_v4 }
  0x8f   :  { %866 = vmatpush2.bf16.msra.mxu0 %v2630_v50 }
  0x92   :  { %868 = vmatmul.mubr.bf16.vlgmr.msra.gmra.mxu0 %v2233_v53 }
  0x93   :  { %877 = vmatprep.mubr.bf16.mxu0 %v2240_v54 }
  0x9a   :  { %878 = vmatmul.mubr.bf16.gmra.mxu0 %v2239_v55  ;;  %v909_v55 = vrot.slane %v904_v49, %v3306_v1 }
 0x112   :  { %v763_v57 = vpop.f32.mrf.mxu0 }
 0x113   :  { %v764_v10 = vadd.f32 %v763_v57, %v182_v6 }
 0x114   :  { %v765_v58 = vpop.f32.mrf.mxu0  ;;  %v816_v62 = vpop.f32.mrf.mxu1 }
 0x115   :  { %v766_v12 = vadd.f32 %v765_v58, %v186_v8  ;;  %v817_v15 = vadd.f32 %v816_v62, %v764_v10 }
 0x116   :  { %v767_v60 = vpop.f32.mrf.mxu0  ;;  %v818_v3 = vpop.f32.mrf.mxu1 }
 0x117   :  { %v768_v16 = vadd.f32 %v767_v60, %v182_v6  ;;  %v819_v18 = vadd.f32 %v818_v3, %v766_v12 }
 0x118   :  { %v769_v63 = vpop.f32.mrf.mxu0  ;;  %v820_v7 = vpop.f32.mrf.mxu1 }
 0x119   :  { %v770_v21 = vadd.f32 %v769_v63, %v186_v8  ;;  %v821_v25 = vadd.f32 %v820_v7, %v768_v16 }
 0x11a   :  { %v773_v0 = vpop.f32.mrf.mxu0  ;;  %v822_v11 = vpop.f32.mrf.mxu1 }
 0x11b   :  { %v774_v26 = vadd.f32 %v773_v0, %v182_v6  ;;  %v823_v29 = vadd.f32 %v822_v11, %v770_v21 }
 0x11c   :  { %v775_v5 = vpop.f32.mrf.mxu0  ;;  %v826_v13 = vpop.f32.mrf.mxu1 }
 0x11d   :  { %v776_v30 = vadd.f32 %v775_v5, %v186_v8  ;;  %v827_v34 = vadd.f32 %v826_v13, %v774_v26 }
 0x11e   :  { %v777_v9 = vpop.f32.mrf.mxu0  ;;  %v828_v23 = vpop.f32.mrf.mxu1 }
 0x11f   :  { %v778_v35 = vadd.f32 %v777_v9, %v182_v6  ;;  %v829_v38 = vadd.f32 %v828_v23, %v776_v30  ;;  %v937_v30 = vstv %s3775_s5 }
 0x120   :  { %v779_v14 = vpop.f32.mrf.mxu0  ;;  %v830_v32 = vpop.f32.mrf.mxu1 }
 0x121   :  { %v780_v39 = vadd.f32 %v779_v14, %v186_v8  ;;  %v831_v43 = vadd.f32 %v830_v32, %v778_v35 }
 0x122   :  { %v832_v41 = vpop.f32.mrf.mxu1 }
 0x123   :  { %v833_v46 = vadd.f32 %v832_v41, %v780_v39 }
 0x152   :  { %v869_v17 = vpop.f32.mrf.mxu0 }
 0x153   :  { %v870_v22 = vadd.f32 %v869_v17, %v817_v15 }
 0x154   :  { %v871_v24 = vpop.f32.mrf.mxu0 }
 0x155   :  { %2797 = vtanh.f32 %v870_v22  ;;  %v872_v27 = vadd.f32 %v871_v24, %v819_v18 }
 0x156   :  { %v873_v28 = vpop.f32.mrf.mxu0 }
 0x157   :  { %2799 = vtanh.f32 %v872_v27  ;;  %v874_v31 = vadd.f32 %v873_v28, %v821_v25  ;;  %v942_v25 = vld [vmem:[%s3771_s1] sm:$0x3]  ;;  %v3325_v27 = vand.u32 127, %v179_v59 }
 0x158   :  { %v875_v33 = vpop.f32.mrf.mxu0 }
 0x159   :  { %2801 = vtanh.f32 %v874_v31  ;;  %v876_v36 = vadd.f32 %v875_v33, %v823_v29  ;;  %v957_v28 = vadd.s32 4294967288, %v3325_v27  ;;  %vm2210_vm6 = vcmp.eq.s32.totalorder %v3325_v27, 0 }
 0x15a   :  { %v879_v37 = vpop.f32.mrf.mxu0 }
 0x15b   :  { %2803 = vtanh.f32 %v876_v36  ;;  %v880_v40 = vadd.f32 %v879_v37, %v827_v34  ;;  %v960_v32 = vsub.s32 %v957_v28, %v3303_v61  ;;  %v955_v34 = vsub.s32 %v3325_v27, %v3303_v61 }
 0x15c   :  { %v881_v42 = vpop.f32.mrf.mxu0 }
 0x15d   :  { %2805 = vtanh.f32 %v880_v40  ;;  %v882_v44 = vadd.f32 %v881_v42, %v829_v38 }
 0x15e   :  { %v883_v45 = vpop.f32.mrf.mxu0 }
 0x15f   :  { %2807 = vtanh.f32 %v882_v44  ;;  %v884_v47 = vadd.f32 %v883_v45, %v831_v43 }
 0x160   :  { %v885_v48 = vpop.f32.mrf.mxu0 }
 0x161   :  { %2809 = vtanh.f32 %v884_v47  ;;  %v886_v50 = vadd.f32 %v885_v48, %v833_v46 }
 0x162   :  { %v2798_v53 = vpop.eup %2797 }
 0x163   :  { %2811 = vtanh.f32 %v886_v50  ;;  %v896_v54 = vmul.f32 %v2798_v53, %v2798_v53 }
 0x164   :  { %v2800_v57 = vpop.eup %2799 }
 0x165   :  { %v897_v58 = vmul.f32 %v2800_v57, %v2800_v57  ;;  %v916_v63 = vmul.f32 %v909_v55, %v896_v54  ;;  %v2640_v57 = vld [vmem:[%s3776_s6 + $0x170] ss:$8 sps:$4 sm:$0xff]  }
 0x166   :  { %v2802_v60 = vpop.eup %2801 }
 0x167   :  { %v898_v62 = vmul.f32 %v2802_v60, %v2802_v60  ;;  %v917_v0 = vmul.f32 %v913_v56, %v897_v58  ;;  %v2642_v58 = vld [vmem:[%s3776_s6 + $0x174] ss:$8 sps:$4 sm:$0xff]   ;;  %v2645_v60 = vld [vmem:[%s3776_s6 + $0x64] ss:$8 sps:$4 sm:$0xff]  }
 0x168   :  { %v2804_v2 = vpop.eup %2803  ;;  %1828 = vmatprep.subr.bf16.mxu0 %v2642_v58  ;;  %v2718_v58 = vld [vmem:[%s3776_s6 + $0x1a0] ss:$8 sps:$4 sm:$0xff]  }
 0x169   :  { %v899_v3 = vmul.f32 %v2804_v2, %v2804_v2  ;;  %v924_v5 = vadd.f32 %v917_v0, %v916_v63  ;;  %v918_v7 = vmul.f32 %v909_v55, %v898_v62  ;;  %v2648_v62 = vld [vmem:[%s3776_s6 + $0x164] ss:$8 sps:$4 sm:$0xff]   ;;  %v2643_v63 = vld [vmem:[%s3776_s6 + $0x60] ss:$8 sps:$4 sm:$0xff]   ;;  %1829 = vmatpush1.bf16.msra.mxu0 %v2640_v57  ;;  %v2651_v2 = vld [vmem:[%s3776_s6 + $0x54] ss:$8 sps:$4 sm:$0xff]  }
 0x16a   :  { %v2806_v6 = vpop.eup %2805  ;;  %v2646_v0 = vld [vmem:[%s3776_s6 + $0x160] ss:$8 sps:$4 sm:$0xff]   ;;  %1830 = vmatprep.subr.bf16.mxu0 %v2648_v62  ;;  %v2717_v57 = vld [vmem:[%s3776_s6 + $0xa4] ss:$8 sps:$4 sm:$0xff]   ;;  %v2723_v62 = vld [vmem:[%s3776_s6 + $0x94] ss:$8 sps:$4 sm:$0xff]  }
 0x16b   :  { %925 = vadd.xlane.f32.xlu0 %v924_v5  ;;  %v919_v8 = vmul.f32 %v913_v56, %v899_v3  ;;  %v900_v9 = vmul.f32 %v2806_v6, %v2806_v6  ;;  %v2654_v3 = vld [vmem:[%s3776_s6 + $0x154] ss:$8 sps:$4 sm:$0xff]   ;;  %v2649_v5 = vld [vmem:[%s3776_s6 + $0x50] ss:$8 sps:$4 sm:$0xff]  }
 0x16c   :  { %v2808_v10 = vpop.eup %2807  ;;  %v2652_v6 = vld [vmem:[%s3776_s6 + $0x150] ss:$8 sps:$4 sm:$0xff]  }
 0x16d   :  { %v927_v11 = vadd.f32 %v919_v8, %v918_v7  ;;  %v901_v12 = vmul.f32 %v2808_v10, %v2808_v10  ;;  %v920_v15 = vmul.f32 %v909_v55, %v900_v9  ;;  %1831 = vmatpush1.bf16.msra.mxu0 %v2646_v0  ;;  %v2657_v7 = vld [vmem:[%s3776_s6 + $0x44] ss:$8 sps:$4 sm:$0xff]   ;;  %v2655_v9 = vld [vmem:[%s3776_s6 + $0x40] ss:$8 sps:$4 sm:$0xff]   ;;  %v2721_v0 = vld [vmem:[%s3776_s6 + $0x90] ss:$8 sps:$4 sm:$0xff]  }
 0x16e   :  { %v2810_v13 = vpop.eup %2809  ;;  %1832 = vmatprep.subr.bf16.mxu0 %v2654_v3  ;;  %v2660_v8 = vld [vmem:[%s3776_s6 + $0x144] ss:$8 sps:$4 sm:$0xff]   ;;  %v2658_v10 = vld [vmem:[%s3776_s6 + $0x140] ss:$8 sps:$4 sm:$0xff]  }
 0x16f   :  { %v902_v14 = vmul.f32 %v2810_v13, %v2810_v13  ;;  %928 = vadd.xlane.f32.xlu0 %v927_v11  ;;  %v921_v16 = vmul.f32 %v913_v56, %v901_v12  ;;  %v2663_v11 = vld [vmem:[%s3776_s6 + $0x34] ss:$8 sps:$4 sm:$0xff]   ;;  %v2661_v13 = vld [vmem:[%s3776_s6 + $0x30] ss:$8 sps:$4 sm:$0xff]   ;;  %v2729_v3 = vld [vmem:[%s3776_s6 + $0x84] ss:$8 sps:$4 sm:$0xff]  }
 0x170   :  { %v2812_v17 = vpop.eup %2811  ;;  %v2666_v12 = vld [vmem:[%s3776_s6 + $0x134] ss:$8 sps:$4 sm:$0xff]  }
 0x171   :  { %v903_v18 = vmul.f32 %v2812_v17, %v2812_v17  ;;  %v930_v21 = vadd.f32 %v921_v16, %v920_v15  ;;  %v922_v22 = vmul.f32 %v909_v55, %v902_v14  ;;  %v2637_v55 = vld [vmem:[%s3776_s6 + $0x70] ss:$8 sps:$4 sm:$0xff]   ;;  %1833 = vmatpush1.bf16.msra.mxu0 %v2652_v6  ;;  %v2669_v15 = vld [vmem:[%s3776_s6 + $0x24] ss:$8 sps:$4 sm:$0xff]   ;;  %v2667_v17 = vld [vmem:[%s3776_s6 + $0x20] ss:$8 sps:$4 sm:$0xff]  }
 0x172   :  { %1834 = vmatprep.subr.bf16.mxu0 %v2660_v8  ;;  %v2664_v14 = vld [vmem:[%s3776_s6 + $0x130] ss:$8 sps:$4 sm:$0xff]   ;;  %v2672_v16 = vld [vmem:[%s3776_s6 + $0x124] ss:$8 sps:$4 sm:$0xff]   ;;  %v2727_v6 = vld [vmem:[%s3776_s6 + $0x80] ss:$8 sps:$4 sm:$0xff]  }
 0x173   :  { %931 = vadd.xlane.f32.xlu1 %v930_v21  ;;  %v923_v23 = vmul.f32 %v913_v56, %v903_v18  ;;  %v2639_v56 = vld [vmem:[%s3776_s6 + $0x74] ss:$8 sps:$4 sm:$0xff]   ;;  %v2670_v18 = vld [vmem:[%s3776_s6 + $0x120] ss:$8 sps:$4 sm:$0xff]  }
 0x174   :  { %1787 = vmatprep.subr.bf16.mxu1 %v2639_v56  ;;  %v2675_v21 = vld [vmem:[%s3776_s6 + $0x14] ss:$8 sps:$4 sm:$0xff]   ;;  %v2715_v56 = vld [vmem:[%s3776_s6 + $0xa0] ss:$8 sps:$4 sm:$0xff]  }
 0x175   :  { %v933_v24 = vadd.f32 %v923_v23, %v922_v22  ;;  %1788 = vmatpush1.bf16.msra.mxu1 %v2637_v55  ;;  %1835 = vmatpush1.bf16.msra.mxu0 %v2658_v10  ;;  %v2678_v22 = vld [vmem:[%s3776_s6 + $0x114] ss:$8 sps:$4 sm:$0xff]   ;;  %v2673_v23 = vld [vmem:[%s3776_s6 + $0x10] ss:$8 sps:$4 sm:$0xff]   ;;  %v2827_v10 = vld [vmem:[%s3789_s24] sm:$0xff] }
 0x176   :  { %1789 = vmatprep.subr.bf16.mxu1 %v2645_v60  ;;  %1836 = vmatprep.subr.bf16.mxu0 %v2666_v12  ;;  %v2712_v55 = vld [vmem:[%s3776_s6 + $0x1b0] ss:$8 sps:$4 sm:$0xff]   ;;  %v2720_v60 = vld [vmem:[%s3776_s6 + $0x1a4] ss:$8 sps:$4 sm:$0xff]   ;;  %v2735_v8 = vld [vmem:[%s3776_s6 + $0x274] ss:$8 sps:$4 sm:$0xff]   ;;  %v1014_v12 = vunpack.c.h.bf16 %v2827_v10 }
 0x177   :  { %934 = vadd.xlane.f32.xlu1 %v933_v24  ;;  %v2676_v24 = vld [vmem:[%s3776_s6 + $0x110] ss:$8 sps:$4 sm:$0xff]  }
 0x179   :  { %1790 = vmatpush1.bf16.msra.mxu1 %v2643_v63  ;;  %1837 = vmatpush1.bf16.msra.mxu0 %v2664_v14  ;;  %v2726_v63 = vld [vmem:[%s3776_s6 + $0x194] ss:$8 sps:$4 sm:$0xff]  }
 0x17a   :  { %1791 = vmatprep.subr.bf16.mxu1 %v2651_v2  ;;  %1838 = vmatprep.subr.bf16.mxu0 %v2672_v16  ;;  %v2724_v2 = vld [vmem:[%s3776_s6 + $0x190] ss:$8 sps:$4 sm:$0xff]   ;;  %v2829_v16 = vld [vmem:[%s3789_s24 + $0x8] sm:$0xff] }
 0x17d   :  { %1792 = vmatpush1.bf16.msra.mxu1 %v2649_v5  ;;  %1839 = vmatpush1.bf16.msra.mxu0 %v2670_v18  ;;  %v2732_v5 = vld [vmem:[%s3776_s6 + $0x184] ss:$8 sps:$4 sm:$0xff]   ;;  %v1016_v18 = vunpack.c.h.bf16 %v2829_v16 }
 0x17e   :  { %1793 = vmatprep.subr.bf16.mxu1 %v2657_v7  ;;  %1840 = vmatprep.subr.bf16.mxu0 %v2678_v22  ;;  %v2730_v7 = vld [vmem:[%s3776_s6 + $0x180] ss:$8 sps:$4 sm:$0xff]  }
 0x181   :  { %1794 = vmatpush1.bf16.msra.mxu1 %v2655_v9  ;;  %1841 = vmatpush1.bf16.msra.mxu0 %v2676_v24  ;;  %v1017_v9 = vunpack.c.l.bf16 %v3196_v19 }
 0x182   :  { %1795 = vmatprep.subr.bf16.mxu1 %v2663_v11  ;;  %v1013_v11 = vunpack.c.l.bf16 %v2827_v10 }
 0x185   :  { %946 = vperm.xlu0 %2480, %v942_v25   ;;  %1796 = vmatpush1.bf16.msra.mxu1 %v2661_v13  ;;  %v2681_v25 = vld [vmem:[%s3776_s6 + $0x4] ss:$8 sps:$4 sm:$0xff]   ;;  %v2828_v13 = vld [vmem:[%s3789_s24 + $0x18] sm:$0xff] }
 0x186   :  { %1797 = vmatprep.subr.bf16.mxu1 %v2669_v15  ;;  %v1019_v14 = vunpack.c.l.bf16 %v2828_v13  ;;  %v1020_v15 = vunpack.c.h.bf16 %v2828_v13 }
 0x189   :  { %1798 = vmatpush1.bf16.msra.mxu1 %v2667_v17  ;;  %v1015_v17 = vunpack.c.l.bf16 %v2829_v16 }
 0x18a   :  { %1799 = vmatprep.subr.bf16.mxu1 %v2675_v21  ;;  %v2830_v21 = vld [vmem:[%s3789_s24 + $0x20] sm:$0xff] }
 0x18b   :  { %v1021_v22 = vunpack.c.l.bf16 %v2830_v21 }
 0x18d   :  { %1800 = vmatpush1.bf16.msra.mxu1 %v2673_v23  ;;  %v1022_v23 = vunpack.c.h.bf16 %v2830_v21 }
 0x18e   :  { %1801 = vmatprep.subr.bf16.mxu1 %v2681_v25  ;;  %v2831_v25 = vld [vmem:[%s3789_s24 + $0x30] sm:$0xff] }
 0x1f4   :  { %v926_v26 = vpop.xlane.xlu0 %925 }
 0x1f5   :  { %v938_v35 = vadd.f32 %v937_v30, %v926_v26  ;;  %v2679_v26 = vld [vmem:[%s3776_s6] ss:$8 sps:$4 sm:$0xff]  }
 0x1f6   :  { %1802 = vmatpush1.bf16.msra.mxu1 %v2679_v26  ;;  %v1025_v26 = vunpack.c.l.bf16 %v2831_v25 }
 0x1f7   :  { %v956_v40 = vrot.slane %v938_v35, %v955_v34  ;;  %v2688_v35 = vld [vmem:[%s3776_s6 + $0x1f0] ss:$8 sps:$4 sm:$0xff]  }
 0x1f8   :  { %v929_v29 = vpop.xlane.xlu0 %928 }
 0x1f9   :  { %v939_v33 = vadd.f32 %v937_v30, %v929_v29 }
 0x1fb   :  { %v961_v38 = vrot.slane %v939_v33, %v960_v32  ;;  %v2687_v33 = vld [vmem:[%s3776_s6 + $0xf4] ss:$8 sps:$4 sm:$0xff]  }
 0x1fc   :  { %v932_v31 = vpop.xlane.xlu1 %931  ;;  %1803 = vmatprep.subr.bf16.mxu1 %v2687_v33  ;;  %v1023_v33 = vunpack.c.l.bf16 %v3201_v20 }
 0x1fd   :  { %v940_v36 = vadd.f32 %v937_v30, %v932_v31  ;;  %v963_v43 = vsel %vm962_vm0, %v961_v38, %v956_v40  ;;  %v2682_v31 = vld [vmem:[%s3776_s6 + $0x100] ss:$8 sps:$4 sm:$0xff]  }
 0x1fe   :  { %v2694_v40 = vld [vmem:[%s3776_s6 + $0x1e0] ss:$8 sps:$4 sm:$0xff]  }
 0x1ff   :  { %v967_v41 = vrot.slane %v940_v36, %v955_v34  ;;  %v2690_v34 = vld [vmem:[%s3776_s6 + $0x1f4] ss:$8 sps:$4 sm:$0xff]   ;;  %v2693_v36 = vld [vmem:[%s3776_s6 + $0xe4] ss:$8 sps:$4 sm:$0xff]  }
 0x200   :  { %v935_v37 = vpop.xlane.xlu1 %934  ;;  %v947_v39 = vpop.permute.xlu0 %946 }
 0x201   :  { %v941_v59 = vadd.f32 %v937_v30, %v935_v37  ;;  %vm948_vm2 = vcmp.lt.s32.totalorder %v3325_v27, %v947_v39  ;;  %v2684_v30 = vld [vmem:[%s3776_s6 + $0x104] ss:$8 sps:$4 sm:$0xff]   ;;  %v2691_v37 = vld [vmem:[%s3776_s6 + $0xe0] ss:$8 sps:$4 sm:$0xff]  }
 0x202   :  { %1842 = vmatprep.subr.bf16.mxu0 %v2684_v30 }
 0x203   :  { %v971_v42 = vrot.slane %v941_v59, %v960_v32  ;;  %v2685_v32 = vld [vmem:[%s3776_s6 + $0xf0] ss:$8 sps:$4 sm:$0xff]   ;;  %1843 = vmatpush1.bf16.msra.mxu0 %v2682_v31  ;;  %v2696_v59 = vld [vmem:[%s3776_s6 + $0x1e4] ss:$8 sps:$4 sm:$0xff]  }
 0x204   :  { %1804 = vmatpush2.bf16.msra.mxu1 %v2685_v32  ;;  %1844 = vmatprep.subr.bf16.mxu0 %v2690_v34  ;;  %v1018_v32 = vunpack.c.h.bf16 %v3196_v19  ;;  %v1024_v34 = vunpack.c.h.bf16 %v3201_v20 }
 0x205   :  { %v972_v44 = vsel %vm962_vm0, %v971_v42, %v967_v41  ;;  %1805 = vmatprep.subr.bf16.mxu1 %v2693_v36  ;;  %v2699_v42 = vld [vmem:[%s3776_s6 + $0xd4] ss:$8 sps:$4 sm:$0xff]  }
 0x206   :  { %v974_v45 = vsel %vm973_vm1, %v972_v44, %v963_v43  ;;  %v2697_v43 = vld [vmem:[%s3776_s6 + $0xd0] ss:$8 sps:$4 sm:$0xff]   ;;  %v2702_v44 = vld [vmem:[%s3776_s6 + $0x1d4] ss:$8 sps:$4 sm:$0xff]  }
 0x207   :  { %v976_v46 = vsel %vm948_vm2, %v974_v45, -1e+30  ;;  %1845 = vmatpush2.bf16.msra.mxu0 %v2688_v35  ;;  %v2700_v45 = vld [vmem:[%s3776_s6 + $0x1d0] ss:$8 sps:$4 sm:$0xff]  }
 0x208   :  { %v978_v61 = vsel %vm977_vm3, %v976_v46, -inf  ;;  %1806 = vmatpush2.bf16.msra.mxu1 %v2691_v37  ;;  %1846 = vmatprep.subr.bf16.mxu0 %v2696_v59  ;;  %v2833_v36 = vld [vmem:[%s3789_s24 + $0x38] sm:$0xff]  ;;  %v2834_v59 = vld [vmem:[%s3789_s24 + $0x50] sm:$0xff] }
 0x209   :  { %979 = vmax.xlane.f32.xlu1 %v978_v61  ;;  %1807 = vmatprep.subr.bf16.mxu1 %v2699_v42  ;;  %v2703_v61 = vld [vmem:[%s3776_s6 + $0xc0] ss:$8 sps:$4 sm:$0xff]   ;;  %v1027_v37 = vunpack.c.l.bf16 %v2833_v36 }
 0x20b   :  { %1847 = vmatpush2.bf16.msra.mxu0 %v2694_v40  ;;  %v1029_v40 = vunpack.c.l.bf16 %v3289_v51 }
 0x20c   :  { %1808 = vmatpush2.bf16.msra.mxu1 %v2697_v43  ;;  %1848 = vmatprep.subr.bf16.mxu0 %v2702_v44 }
 0x20f   :  { %1849 = vmatpush2.bf16.msra.mxu0 %v2700_v45 }
 0x292   :  { %v980_v47 = vpop.xlane.xlu1 %979 }
 0x293   :  { %v981_v48 = vsub.f32 %v976_v46, %v980_v47  ;;  %v2705_v46 = vld [vmem:[%s3776_s6 + $0xc4] ss:$8 sps:$4 sm:$0xff]  }
 0x294   :  { %v2708_v47 = vld [vmem:[%s3776_s6 + $0x1c4] ss:$8 sps:$4 sm:$0xff]   ;;  %1809 = vmatprep.subr.bf16.mxu1 %v2705_v46 }
 0x295   :  { %v982_v49 = vmul.f32 1.442695, %v981_v48  ;;  %v2706_v48 = vld [vmem:[%s3776_s6 + $0x1c0] ss:$8 sps:$4 sm:$0xff]   ;;  %1810 = vmatpush2.bf16.msra.mxu1 %v2703_v61  ;;  %1850 = vmatprep.subr.bf16.mxu0 %v2708_v47  ;;  %v1030_v47 = vunpack.c.h.bf16 %v3289_v51 }
 0x296   :  { %1851 = vmatpush2.bf16.msra.mxu0 %v2706_v48 }
 0x297   :  { %2813 = vpow2.f32 %v982_v49 }
 0x2a4   :  { %v2814_v50 = vpop.eup %2813 }
 0x2a5   :  { %v3336_v53 = vsel %vm948_vm2, %v2814_v50, 0.0  ;;  %v2711_v50 = vld [vmem:[%s3776_s6 + $0xb4] ss:$8 sps:$4 sm:$0xff]  }
 0x2a6   :  { %v985_v54 = vsel %vm977_vm3, %v3336_v53, 0.0  ;;  %1811 = vmatprep.subr.bf16.mxu1 %v2711_v50 }
 0x2a7   :  { %986 = vadd.xlane.f32.xlu1 %v985_v54  ;;  %v2714_v54 = vld [vmem:[%s3776_s6 + $0x1b4] ss:$8 sps:$4 sm:$0xff]  }
 0x2a8   :  { %1852 = vmatprep.subr.bf16.mxu0 %v2714_v54 }
 0x2a9   :  { %1853 = vmatpush2.bf16.msra.mxu0 %v2712_v55 }
 0x2aa   :  { %1854 = vmatprep.subr.bf16.mxu0 %v2720_v60 }
 0x2ad   :  { %1855 = vmatpush2.bf16.msra.mxu0 %v2718_v58  ;;  %v1035_v58 = vunpack.c.l.bf16 %v3294_v52 }
 0x2ae   :  { %1856 = vmatprep.subr.bf16.mxu0 %v2726_v63 }
 0x2b1   :  { %1857 = vmatpush2.bf16.msra.mxu0 %v2724_v2 }
 0x2b2   :  { %1858 = vmatprep.subr.bf16.mxu0 %v2732_v5 }
 0x2b5   :  { %1859 = vmatpush2.bf16.msra.mxu0 %v2730_v7 }
 0x330   :  { %v987_v28 = vpop.xlane.xlu1 %986 }
 0x331   :  { %v988_v29 = vmax.f32 %v987_v28, 1e-30  ;;  %v1026_v28 = vunpack.c.h.bf16 %v2831_v25 }
 0x333   :  { %2815 = vrcp.f32 %v988_v29  ;;  %v2832_v29 = vld [vmem:[%s3789_s24 + $0x48] sm:$0xff] }
 0x334   :  { %v1031_v30 = vunpack.c.l.bf16 %v2832_v29  ;;  %v1032_v31 = vunpack.c.h.bf16 %v2832_v29 }
 0x340   :  { %v2816_v38 = vpop.eup %2815 }
 0x341   :  { %v990_v39 = vmul.f32 %v2816_v38, %v3336_v53  ;;  %v2709_v53 = vld [vmem:[%s3776_s6 + $0xb0] ss:$8 sps:$4 sm:$0xff]   ;;  %v1028_v38 = vunpack.c.h.bf16 %v2833_v36 }
 0x342   :  { %1812 = vmatpush2.bf16.msra.mxu1 %v2709_v53 }
 0x343   :  { %v994_v41 = vrot.slane %v990_v39, %v3306_v1  ;;  %v1005_v49 = vrot.slane %v990_v39, %v3312_v4  ;;  %1813 = vmatprep.subr.bf16.mxu1 %v2717_v57  ;;  %v1033_v39 = vunpack.c.l.bf16 %v2834_v59  ;;  %v1034_v57 = vunpack.c.h.bf16 %v2834_v59 }
 0x345   :  { %996 = vbcast.lane.b32.xlu1 %v994_v41, 256 }
 0x346   :  { %1814 = vmatpush2.bf16.msra.mxu1 %v2715_v56 }
 0x347   :  { %1815 = vmatprep.subr.bf16.mxu1 %v2723_v62 }
 0x349   :  { %1000 = vbcast.lane.b32.xlu1 %v994_v41, 264 }
 0x34a   :  { %1816 = vmatpush2.bf16.msra.mxu1 %v2721_v0  ;;  %v1036_v0 = vunpack.c.h.bf16 %v3294_v52 }
 0x34b   :  { %1817 = vmatprep.subr.bf16.mxu1 %v2729_v3 }
 0x34d   :  { %1007 = vbcast.lane.b32.xlu1 %v1005_v49, 256 }
 0x34e   :  { %1818 = vmatpush2.bf16.msra.mxu1 %v2727_v6 }
 0x34f   :  { %1869 = vmatprep.subr.bf16.mxu1 %v2735_v8 }
 0x351   :  { %1011 = vbcast.lane.b32.xlu1 %v1005_v49, 264 }
 0x3b7   :  { %v997_v24 = vpop.permute.xlu1 %996 }
 0x3b8   :  { %v1041_v35 = vmul.f32 %v1017_v9, %v997_v24  ;;  %v1037_v41 = vmul.f32 %v1013_v11, %v997_v24  ;;  %v1038_v19 = vmul.f32 %v1014_v12, %v997_v24  ;;  %v1039_v42 = vmul.f32 %v1015_v17, %v997_v24 }
 0x3b9   :  { %v1040_v43 = vmul.f32 %v1016_v18, %v997_v24  ;;  %v1042_v48 = vmul.f32 %v1018_v32, %v997_v24 }
 0x3bb   :  { %v1001_v44 = vpop.permute.xlu1 %1000 }
 0x3bc   :  { %v1043_v20 = vmul.f32 %v1019_v14, %v1001_v44  ;;  %v1044_v45 = vmul.f32 %v1020_v15, %v1001_v44  ;;  %v1045_v46 = vmul.f32 %v1021_v22, %v1001_v44  ;;  %v1046_v61 = vmul.f32 %v1022_v23, %v1001_v44 }
 0x3bd   :  { %v1047_v49 = vmul.f32 %v1023_v33, %v1001_v44  ;;  %v1048_v50 = vmul.f32 %v1024_v34, %v1001_v44 }
 0x3be   :  { %v1061_v53 = vadd.f32 %v1043_v20, %v1037_v41  ;;  %v1068_v54 = vadd.f32 %v1044_v45, %v1038_v19  ;;  %v1075_v55 = vadd.f32 %v1045_v46, %v1039_v42  ;;  %v1082_v56 = vadd.f32 %v1046_v61, %v1040_v43 }
 0x3bf   :  { %v1089_v60 = vadd.f32 %v1047_v49, %v1041_v35  ;;  %v3568_v62 = vadd.f32 %v1048_v50, %v1042_v48  ;;  %v1008_v63 = vpop.permute.xlu1 %1007 }
 0x3c0   :  { %v1062_v2 = vrot.slane %v1061_v53, 4  ;;  %v1076_v3 = vrot.slane %v1075_v55, 4  ;;  %v1049_v5 = vmul.f32 %v1025_v26, %v1008_v63  ;;  %v1050_v6 = vmul.f32 %v1026_v28, %v1008_v63 }
 0x3c1   :  { %v1090_v51 = vrot.slane %v1089_v60, 4  ;;  %v1051_v7 = vmul.f32 %v1027_v37, %v1008_v63  ;;  %v1053_v8 = vmul.f32 %v1029_v40, %v1008_v63  ;;  %v1052_v11 = vmul.f32 %v1028_v38, %v1008_v63 }
 0x3c2   :  { %v1063_v9 = vadd.f32 %v1062_v2, %v1061_v53  ;;  %v1077_v10 = vadd.f32 %v1076_v3, %v1075_v55  ;;  %v1054_v12 = vmul.f32 %v1030_v47, %v1008_v63  ;;  %v1069_v15 = vrot.slane %v1068_v54, 4 }
 0x3c3   :  { %v3571_v13 = vadd.f32 %v1090_v51, %v1089_v60  ;;  %v1012_v14 = vpop.permute.xlu1 %1011  ;;  %v1083_v16 = vrot.slane %v1082_v56, 4  ;;  %v1097_v17 = vrot.slane %v3568_v62, 4 }
 0x3c4   :  { %v1064_v18 = vrot.slane %v1063_v9, 2  ;;  %v1078_v52 = vrot.slane %v1077_v10, 2  ;;  %v1055_v21 = vmul.f32 %v1031_v30, %v1012_v14  ;;  %v1056_v22 = vmul.f32 %v1032_v31, %v1012_v14 }
 0x3c5   :  { %v1057_v23 = vmul.f32 %v1033_v39, %v1012_v14  ;;  %v1058_v24 = vmul.f32 %v1034_v57, %v1012_v14  ;;  %v1059_v25 = vmul.f32 %v1035_v58, %v1012_v14  ;;  %v1060_v26 = vmul.f32 %v1036_v0, %v1012_v14 }
 0x3c6   :  { %v1065_v28 = vadd.f32 %v1064_v18, %v1063_v9  ;;  %v1079_v29 = vadd.f32 %v1078_v52, %v1077_v10  ;;  %v1103_v32 = vadd.f32 %v1055_v21, %v1049_v5  ;;  %v1110_v33 = vadd.f32 %v1056_v22, %v1050_v6 }
 0x3c7   :  { %v1117_v34 = vadd.f32 %v1057_v23, %v1051_v7  ;;  %v1124_v35 = vadd.f32 %v1058_v24, %v1052_v11  ;;  %v1131_v36 = vadd.f32 %v1059_v25, %v1053_v8  ;;  %v3574_v37 = vadd.f32 %v1060_v26, %v1054_v12 }
 0x3c8   :  { %v1104_v38 = vrot.slane %v1103_v32, 4  ;;  %v1070_v59 = vadd.f32 %v1069_v15, %v1068_v54  ;;  %v1111_v40 = vrot.slane %v1110_v33, 4  ;;  %v1084_v41 = vadd.f32 %v1083_v16, %v1082_v56 }
 0x3c9   :  { %v1118_v19 = vrot.slane %v1117_v34, 4  ;;  %v1132_v30 = vrot.slane %v1131_v36, 4  ;;  %v1125_v31 = vrot.slane %v1124_v35, 4  ;;  %v1066_v39 = vrot.slane %v1065_v28, 1 }
 0x3ca   :  { %v1105_v42 = vadd.f32 %v1104_v38, %v1103_v32  ;;  %v1071_v43 = vrot.slane %v1070_v59, 2  ;;  %v1112_v44 = vadd.f32 %v1111_v40, %v1110_v33  ;;  %v1085_v20 = vrot.slane %v1084_v41, 2 }
 0x3cb   :  { %v1119_v45 = vadd.f32 %v1118_v19, %v1117_v34  ;;  %v1133_v46 = vadd.f32 %v1132_v30, %v1131_v36  ;;  %v1126_v61 = vadd.f32 %v1125_v31, %v1124_v35  ;;  %v1067_v47 = vadd.f32 %v1066_v39, %v1065_v28 }
 0x3cc   :  { %v1106_v48 = vrot.slane %v1105_v42, 2  ;;  %v1072_v49 = vadd.f32 %v1071_v43, %v1070_v59  ;;  %v1113_v50 = vrot.slane %v1112_v44, 2  ;;  %v1086_v53 = vadd.f32 %v1085_v20, %v1084_v41  ;;  %v2733_v20 = vld [vmem:[%s3776_s6 + $0x270] ss:$8 sps:$4 sm:$0xff]  }
 0x3cd   :  { %v1120_v55 = vrot.slane %v1119_v45, 2  ;;  %v1127_v54 = vrot.slane %v1126_v61, 2  ;;  %v1145_v57 = vpack.c.bf16 %v1067_v47, %v1067_v47  ;;  %v1080_v56 = vrot.slane %v1079_v29, 1 }
 0x3ce   :  { %v1107_v58 = vadd.f32 %v1106_v48, %v1105_v42  ;;  %v1073_v60 = vrot.slane %v1072_v49, 1  ;;  %v1114_v63 = vadd.f32 %v1113_v50, %v1112_v44  ;;  %v1087_v0 = vrot.slane %v1086_v53, 1 }
 0x3cf   :  { %v1121_v2 = vadd.f32 %v1120_v55, %v1119_v45  ;;  %v1128_v3 = vadd.f32 %v1127_v54, %v1126_v61  ;;  %v1277_v5 = vunpack.c.l.b16 %v1145_v57  ;;  %v1081_v51 = vadd.f32 %v1080_v56, %v1079_v29  ;;  %v2736_v55 = vld [vmem:[%s3776_s6 + $0x260] ss:$8 sps:$4 sm:$0xff]  }
 0x3d0   :  { %v1074_v6 = vadd.f32 %v1073_v60, %v1072_v49  ;;  %v1115_v7 = vrot.slane %v1114_v63, 1  ;;  %v1088_v8 = vadd.f32 %v1087_v0, %v1086_v53  ;;  %v1108_v9 = vrot.slane %v1107_v58, 1  ;;  %v2738_v49 = vld [vmem:[%s3776_s6 + $0x264] ss:$8 sps:$4 sm:$0xff]  }
 0x3d1   :  { %v1129_v10 = vrot.slane %v1128_v3, 1  ;;  %v1122_v11 = vrot.slane %v1121_v2, 1  ;;  %v1147_v12 = vpack.c.bf16 %v1081_v51, %v1081_v51  ;;  %v1098_v14 = vadd.f32 %v1097_v17, %v3568_v62 }
 0x3d2   :  { %v1116_v15 = vadd.f32 %v1115_v7, %v1114_v63  ;;  %v1146_v16 = vpack.c.bf16 %v1074_v6, %v1074_v6  ;;  %v1148_v18 = vpack.c.bf16 %v1088_v8, %v1088_v8  ;;  %v1109_v52 = vadd.f32 %v1108_v9, %v1107_v58  ;;  %v2741_v58 = vld [vmem:[%s3776_s6 + $0x254] ss:$8 sps:$4 sm:$0xff]   ;;  %v2744_v7 = vld [vmem:[%s3776_s6 + $0x244] ss:$8 sps:$4 sm:$0xff]  }
 0x3d3   :  { %v1130_v21 = vadd.f32 %v1129_v10, %v1128_v3  ;;  %v1123_v22 = vadd.f32 %v1122_v11, %v1121_v2  ;;  %v1279_v23 = vunpack.c.l.b16 %v1147_v12  ;;  %v1099_v24 = vrot.slane %v1098_v14, 2  ;;  %v2739_v3 = vld [vmem:[%s3776_s6 + $0x250] ss:$8 sps:$4 sm:$0xff]   ;;  %v2742_v11 = vld [vmem:[%s3776_s6 + $0x240] ss:$8 sps:$4 sm:$0xff]  }
 0x3d4   :  { %v1152_v25 = vpack.c.bf16 %v1116_v15, %v1116_v15  ;;  %v1278_v26 = vunpack.c.l.b16 %v1146_v16  ;;  %v1280_v28 = vunpack.c.l.b16 %v1148_v18  ;;  %v1151_v29 = vpack.c.bf16 %v1109_v52, %v1109_v52  ;;  %v2745_v16 = vld [vmem:[%s3776_s6 + $0x230] ss:$8 sps:$4 sm:$0xff]   ;;  %v2750_v18 = vld [vmem:[%s3776_s6 + $0x224] ss:$8 sps:$4 sm:$0xff]   ;;  %v2748_v52 = vld [vmem:[%s3776_s6 + $0x220] ss:$8 sps:$4 sm:$0xff]  }
 0x3d5   :  { %v1154_v32 = vpack.c.bf16 %v1130_v21, %v1130_v21  ;;  %v1153_v33 = vpack.c.bf16 %v1123_v22, %v1123_v22  ;;  %v1100_v34 = vadd.f32 %v1099_v24, %v1098_v14  ;;  %v1139_v35 = vrot.slane %v3574_v37, 4  ;;  %v2747_v14 = vld [vmem:[%s3776_s6 + $0x234] ss:$8 sps:$4 sm:$0xff]   ;;  %v2751_v22 = vld [vmem:[%s3776_s6 + $0x210] ss:$8 sps:$4 sm:$0xff]  }
 0x3d6   :  { %v1284_v36 = vunpack.c.l.b16 %v1152_v25  ;;  %v1283_v38 = vunpack.c.l.b16 %v1151_v29  ;;  %v1092_v62 = vrot.slane %v3571_v13, 2  ;;  %v1134_v17 = vrot.slane %v1133_v46, 2  ;;  %v2753_v21 = vld [vmem:[%s3776_s6 + $0x214] ss:$8 sps:$4 sm:$0xff]   ;;  %v2754_v24 = vld [vmem:[%s3776_s6 + $0x200] ss:$8 sps:$4 sm:$0xff]  }
 0x3d7   :  { %v1286_v59 = vunpack.c.l.b16 %v1154_v32  ;;  %v1285_v40 = vunpack.c.l.b16 %v1153_v33  ;;  %v1101_v41 = vrot.slane %v1100_v34, 1  ;;  %v1140_v19 = vadd.f32 %v1139_v35, %v3574_v37  ;;  %v2759_v25 = vld [vmem:[%s3776_s6 + $0x2f4] ss:$8 sps:$4 sm:$0xff]   ;;  %v2760_v29 = vld [vmem:[%s3776_s6 + $0x2e0] ss:$8 sps:$4 sm:$0xff]  }
 0x3d8   :  { %v1290_v30 = vsel %vm973_vm1, %v1284_v36, %v1278_v26  ;;  %v1289_v31 = vsel %vm973_vm1, %v1283_v38, %v1277_v5  ;;  %v1093_v39 = vadd.f32 %v1092_v62, %v3571_v13  ;;  %v1135_v42 = vadd.f32 %v1134_v17, %v1133_v46  ;;  %v2757_v26 = vld [vmem:[%s3776_s6 + $0x2f0] ss:$8 sps:$4 sm:$0xff]   ;;  %v2765_v32 = vld [vmem:[%s3776_s6 + $0x2d4] ss:$8 sps:$4 sm:$0xff]   ;;  %v2766_v35 = vld [vmem:[%s3776_s6 + $0x2c0] ss:$8 sps:$4 sm:$0xff]  }
 0x3d9   :  { %v1296_v43 = vpack.c.b16 %v1290_v30, %v1290_v30  ;;  %v1292_v44 = vsel %vm973_vm1, %v1286_v59, %v1280_v28  ;;  %v1295_v45 = vpack.c.b16 %v1289_v31, %v1289_v31  ;;  %v1291_v61 = vsel %vm973_vm1, %v1285_v40, %v1279_v23  ;;  %v2756_v23 = vld [vmem:[%s3776_s6 + $0x204] ss:$8 sps:$4 sm:$0xff]   ;;  %v2763_v33 = vld [vmem:[%s3776_s6 + $0x2d0] ss:$8 sps:$4 sm:$0xff]   ;;  %v2771_v36 = vld [vmem:[%s3776_s6 + $0x2b4] ss:$8 sps:$4 sm:$0xff]  }
 0x3da   :  { %v1298_v47 = vpack.c.b16 %v1292_v44, %v1292_v44  ;;  %v1297_v48 = vpack.c.b16 %v1291_v61, %v1291_v61  ;;  %v1141_v37 = vrot.slane %v1140_v19, 2  ;;  %v1094_v13 = vrot.slane %v1093_v39, 1  ;;  %v2762_v28 = vld [vmem:[%s3776_s6 + $0x2e4] ss:$8 sps:$4 sm:$0xff]   ;;  %v2769_v38 = vld [vmem:[%s3776_s6 + $0x2b0] ss:$8 sps:$4 sm:$0xff]  }
 0x3db   :  { %1819 = vmatprep.mubr.bf16.mxu1 %v1296_v43  ;;  %v1136_v46 = vrot.slane %v1135_v42, 1  ;;  %v1102_v50 = vadd.f32 %v1101_v41, %v1100_v34  ;;  %v2768_v34 = vld [vmem:[%s3776_s6 + $0x2c4] ss:$8 sps:$4 sm:$0xff]   ;;  %v2772_v17 = vld [vmem:[%s3776_s6 + $0x2a0] ss:$8 sps:$4 sm:$0xff]  }
 0x3dc   :  { %1860 = vmatprep.mubr.bf16.mxu0 %v1298_v47  ;;  %1820 = vmatmul.mubr.bf16.vlgmr.msra.gmra.mxu1 %v1295_v45  ;;  %v1142_v53 = vadd.f32 %v1141_v37, %v1140_v19  ;;  %v1095_v54 = vadd.f32 %v1094_v13, %v1093_v39  ;;  %v2774_v62 = vld [vmem:[%s3776_s6 + $0x2a4] ss:$8 sps:$4 sm:$0xff]   ;;  %v2777_v59 = vld [vmem:[%s3776_s6 + $0x294] ss:$8 sps:$4 sm:$0xff]   ;;  %v2775_v40 = vld [vmem:[%s3776_s6 + $0x290] ss:$8 sps:$4 sm:$0xff]  }
 0x3dd   :  { %1861 = vmatmul.mubr.bf16.vlgmr.msra.gmra.mxu0 %v1297_v48  ;;  %1870 = vmatpush1.bf16.msra.mxu1 %v2733_v20  ;;  %v1137_v57 = vadd.f32 %v1136_v46, %v1135_v42  ;;  %v1150_v2 = vpack.c.bf16 %v1102_v50, %v1102_v50  ;;  %v2780_v41 = vld [vmem:[%s3776_s6 + $0x284] ss:$8 sps:$4 sm:$0xff]   ;;  %v2778_v19 = vld [vmem:[%s3776_s6 + $0x280] ss:$8 sps:$4 sm:$0xff]  }
 0x3de   :  { %v1143_v56 = vrot.slane %v1142_v53, 1  ;;  %1871 = vmatprep.subr.bf16.mxu1 %v2738_v49  ;;  %v1149_v60 = vpack.c.bf16 %v1095_v54, %v1095_v54  ;;  %v1253_v47 = vld [vmem:[%s3777_s7] sm:$0x3] }
 0x3df   :  { %v1155_v63 = vpack.c.bf16 %v1137_v57, %v1137_v57  ;;  %v1282_v9 = vunpack.c.l.b16 %v1150_v2  ;;  %v1258_v48 = vrot.slane %v1253_v47, %v3306_v1  ;;  %v1262_v37 = vrot.slane %v1253_v47, %v3312_v4 }
 0x3e0   :  { %v1144_v0 = vadd.f32 %v1143_v56, %v1142_v53  ;;  %v1281_v5 = vunpack.c.l.b16 %v1149_v60 }
 0x3e1   :  { %1872 = vmatpush1.bf16.msra.mxu1 %v2736_v55  ;;  %v1287_v51 = vunpack.c.l.b16 %v1155_v63 }
 0x3e2   :  { %v1156_v6 = vpack.c.bf16 %v1144_v0, %v1144_v0  ;;  %1873 = vmatprep.subr.bf16.mxu1 %v2741_v58 }
 0x3e3   :  { %v1293_v8 = vsel %vm973_vm1, %v1287_v51, %v1281_v5  ;;  %v2781_v5 = vld [vmem:[%s3780_s10 + $0x78] sm:$0xff]  }
 0x3e4   :  { %v1288_v10 = vunpack.c.l.b16 %v1156_v6  ;;  %v1299_v30 = vpack.c.b16 %v1293_v8, %v1293_v8  ;;  %v2782_v51 = vld [vmem:[%s3780_s10 + $0x38] sm:$0xff]   ;;  %v2783_v6 = vld [vmem:[%s3780_s10 + $0x70] sm:$0xff]   ;;  %2455 = vmatprep.subr.bf16.mxu0 %v2781_v5  ;;  %v2451_v5 = vld [vmem:[%s3783_s13] ss:$0 sm:$0xff]  ;;  %s2179_s13 = sld [smem:[#allocation3]] }
 0x3e5   :  { %1874 = vmatpush1.bf16.msra.mxu1 %v2739_v3  ;;  %2456 = vmatpush3.bf16.msra.mxu0 %v2782_v51 }
 0x3e6   :  { %v1294_v12 = vsel %vm973_vm1, %v1288_v10, %v1282_v9  ;;  %1875 = vmatprep.subr.bf16.mxu1 %v2744_v7  ;;  %2457 = vmatprep.subr.bf16.mxu0 %v2783_v6  ;;  %v2453_v6 = vld [vmem:[%s3784_s14 + $0x1] ss:$0 sm:$0xff] }
 0x3e7   :  { %v1300_v15 = vpack.c.b16 %v1294_v12, %v1294_v12 }
 0x3e9   :  { %1901 = vmatprep.mubr.bf16.mxu1 %v1300_v15  ;;  %1876 = vmatpush1.bf16.msra.mxu1 %v2742_v11 }
 0x3ea   :  { %1877 = vmatprep.subr.bf16.mxu1 %v2747_v14 }
 0x3ed   :  { %1878 = vmatpush1.bf16.msra.mxu1 %v2745_v16 }
 0x3ee   :  { %1879 = vmatprep.subr.bf16.mxu1 %v2750_v18  ;;  %v2784_v18 = vld [vmem:[%s3780_s10 + $0x30] sm:$0xff]  }
 0x3ef   :  { %2458 = vmatpush3.bf16.msra.mxu0 %v2784_v18 }
 0x3f1   :  { %1880 = vmatpush1.bf16.msra.mxu1 %v2748_v52  ;;  %v2785_v52 = vld [vmem:[%s3780_s10 + $0x68] sm:$0xff]  }
 0x3f2   :  { %1881 = vmatprep.subr.bf16.mxu1 %v2753_v21  ;;  %v2786_v21 = vld [vmem:[%s3780_s10 + $0x28] sm:$0xff]   ;;  %2459 = vmatprep.subr.bf16.mxu0 %v2785_v52 }
 0x3f3   :  { %2460 = vmatpush3.bf16.msra.mxu0 %v2786_v21  ;;  %v2180_v21 = vstv %s2179_s13 }
 0x3f5   :  { %1882 = vmatpush1.bf16.msra.mxu1 %v2751_v22  ;;  %v2787_v22 = vld [vmem:[%s3780_s10 + $0x60] sm:$0xff]  }
 0x3f6   :  { %1883 = vmatprep.subr.bf16.mxu1 %v2756_v23  ;;  %v2788_v23 = vld [vmem:[%s3780_s10 + $0x20] sm:$0xff]   ;;  %2461 = vmatprep.subr.bf16.mxu0 %v2787_v22 }
 0x3f7   :  { %2462 = vmatpush3.bf16.msra.mxu0 %v2788_v23 }
 0x3f9   :  { %1884 = vmatpush1.bf16.msra.mxu1 %v2754_v24  ;;  %v2789_v24 = vld [vmem:[%s3780_s10 + $0x58] sm:$0xff]  }
 0x3fa   :  { %1885 = vmatprep.subr.bf16.mxu1 %v2759_v25  ;;  %v2790_v25 = vld [vmem:[%s3780_s10 + $0x18] sm:$0xff]   ;;  %2463 = vmatprep.subr.bf16.mxu0 %v2789_v24 }
 0x3fb   :  { %2464 = vmatpush3.bf16.msra.mxu0 %v2790_v25 }
 0x3fd   :  { %1886 = vmatpush2.bf16.msra.mxu1 %v2757_v26  ;;  %v2791_v26 = vld [vmem:[%s3780_s10 + $0x50] sm:$0xff]  }
 0x3fe   :  { %1887 = vmatprep.subr.bf16.mxu1 %v2762_v28  ;;  %v2792_v28 = vld [vmem:[%s3780_s10 + $0x10] sm:$0xff]   ;;  %2465 = vmatprep.subr.bf16.mxu0 %v2791_v26 }
 0x3ff   :  { %2466 = vmatpush3.bf16.msra.mxu0 %v2792_v28 }
 0x401   :  { %1888 = vmatpush2.bf16.msra.mxu1 %v2760_v29  ;;  %v2793_v29 = vld [vmem:[%s3780_s10 + $0x48] sm:$0xff]  }
 0x402   :  { %1889 = vmatprep.subr.bf16.mxu1 %v2765_v32  ;;  %v2794_v32 = vld [vmem:[%s3780_s10 + $0x8] sm:$0xff]   ;;  %2467 = vmatprep.subr.bf16.mxu0 %v2793_v29 }
 0x403   :  { %2468 = vmatpush3.bf16.msra.mxu0 %v2794_v32 }
 0x405   :  { %1890 = vmatpush2.bf16.msra.mxu1 %v2763_v33  ;;  %v2795_v33 = vld [vmem:[%s3780_s10 + $0x40] sm:$0xff]  }
 0x406   :  { %1891 = vmatprep.subr.bf16.mxu1 %v2768_v34  ;;  %v2796_v34 = vld [vmem:[%s3780_s10] sm:$0xff]   ;;  %2469 = vmatprep.subr.bf16.mxu0 %v2795_v33 }
 0x407   :  { %2470 = vmatpush3.bf16.msra.mxu0 %v2796_v34 }
 0x409   :  { %1892 = vmatpush2.bf16.msra.mxu1 %v2766_v35 }
 0x40a   :  { %1893 = vmatprep.subr.bf16.mxu1 %v2771_v36 }
 0x40d   :  { %1894 = vmatpush2.bf16.msra.mxu1 %v2769_v38 }
 0x40e   :  { %1895 = vmatprep.subr.bf16.mxu1 %v2774_v62  ;;  %v1912_v62 = vld [vmem:[%s3778_s8] sm:$0x3] }
 0x411   :  { %1896 = vmatpush2.bf16.msra.mxu1 %v2772_v17  ;;  %v1913_v17 = vld [vmem:[%s3779_s9] sm:$0x3] }
 0x412   :  { %1897 = vmatprep.subr.bf16.mxu1 %v2777_v59  ;;  %v1940_v59 = vrot.slane %v1912_v62, %v3306_v1 }
 0x415   :  { %1898 = vmatpush2.bf16.msra.mxu1 %v2775_v40  ;;  %v1944_v40 = vrot.slane %v1912_v62, %v3312_v4 }
 0x416   :  { %1899 = vmatprep.subr.bf16.mxu1 %v2780_v41 }
 0x419   :  { %1900 = vmatpush2.bf16.msra.mxu1 %v2778_v19 }
 0x41c   :  { %1902 = vmatmul.mubr.bf16.vlgmr.msra.gmra.mxu1 %v1299_v30  ;;  %v1953_v30 = vrot.slane %v1913_v17, %v3306_v1 }
 0x49c   :  { %v1821_v31 = vpop.f32.mrf.mxu1 }
 0x49d   :  { %v1862_v39 = vpop.f32.mrf.mxu0  ;;  %v1822_v49 = vadd.f32 %v1821_v31, %v1258_v48  ;;  %v1957_v31 = vrot.slane %v1913_v17, %v3312_v4  ;;  %v2433_v48 = vld [vmem:[%s3781_s11] ss:$0 sm:$0xff] }
 0x49e   :  { %v1823_v42 = vpop.f32.mrf.mxu1 }
 0x49f   :  { %v1864_v43 = vpop.f32.mrf.mxu0  ;;  %v1824_v13 = vadd.f32 %v1823_v42, %v1262_v37  ;;  %v1863_v46 = vadd.f32 %v1862_v39, %v1822_v49 }
 0x4a0   :  { %v1825_v44 = vpop.f32.mrf.mxu1 }
 0x4a1   :  { %v1866_v20 = vpop.f32.mrf.mxu0  ;;  %v1865_v53 = vadd.f32 %v1864_v43, %v1824_v13 }
 0x4a2   :  { %v1826_v45 = vpop.f32.mrf.mxu1 }
 0x4a3   :  { %v1867_v61 = vpop.f32.mrf.mxu0 }
 0x4dc   :  { %v1903_v50 = vpop.f32.mrf.mxu1 }
 0x4dd   :  { %v1904_v55 = vadd.f32 %v1903_v50, %v1863_v46 }
 0x4de   :  { %v1905_v54 = vpop.f32.mrf.mxu1 }
 0x4df   :  { %v1910_v57 = vmax.f32 %v1904_v55, 0.0  ;;  %v1906_v56 = vadd.f32 %v1905_v54, %v1865_v53 }
 0x4e0   :  { %v1907_v58 = vpop.f32.mrf.mxu1 }
 0x4e1   :  { %v1911_v60 = vmax.f32 %v1906_v56, 0.0  ;;  %v1915_v0 = vsel %vm1914_vm4, %v1910_v57, 0.0 }
 0x4e2   :  { %v1908_v63 = vpop.f32.mrf.mxu1 }
 0x4e3   :  { %v1916_v2 = vsel %vm1914_vm4, %v1911_v60, 0.0 }
 0x4e4   :  { %v1917_v3 = vadd.f32 %v1916_v2, %v1915_v0  ;;  %v2450_v2 = vld [vmem:[%s3782_s12] ss:$0 sm:$0xff]  ;;  %s2454_s12 = sld [smem:[#allocation3 + $0x1]] }
 0x4e6   :  { %1918 = vadd.xlane.f32.xlu1 %v1917_v3 }
 0x56f   :  { %v1919_v7 = vpop.xlane.xlu1 %1918 }
 0x570   :  { %v1921_v8 = vmul.f32 0.00390625, %v1919_v7  ;;  %v2452_v7 = vld [vmem:[%s3784_s14] ss:$0 sm:$0xff]  ;;  %s2873_s14 = smov [#allocation6]  }
 0x571   :  { %s2220_s17 = sshll.u32 %s2873_s14, 4  ;;  %s2221_s17 = int_to_ptr.vmem [resolvable:$true] %s2220_s17 }
 0x572   :  { %v1922_v9 = vsub.f32 %v1910_v57, %v1921_v8  ;;  %v1923_v10 = vsub.f32 %v1911_v60, %v1921_v8  ;;  %s2847_s18 = scalar_lea.vmem %s2221_s17, 32  ;;  %p2852_p6 = scmp.lt.s32.totalorder %s2221_s17, %s2221_s17 }
 0x573   :  { %p2848_p5 = scmp.ne.s32.totalorder %s2221_s17, %s2847_s18  ;;  %p2853_p7 = scmp.lt.s32.totalorder %s2847_s18, %s2847_s18 }
 0x574   :  { %v1924_v11 = vmul.f32 %v1922_v9, %v1922_v9  ;;  %v1925_v12 = vmul.f32 %v1923_v10, %v1923_v10 }
 0x575   :  { %p2854_p8 = por %p2853_p7, %p2852_p6 }
 0x576   :  { %v1926_v14 = vsel %vm1914_vm4, %v1924_v11, 0.0  ;;  %v1927_v15 = vsel %vm1914_vm4, %v1925_v12, 0.0 }
 0x577   :  { %v1928_v16 = vadd.f32 %v1927_v15, %v1926_v14  ;;  %v2192_v14 = vstv %s2454_s12  ;;  %p2855_p9 = pnand %p2854_p8, %p2848_p5 }
 0x579   :  { %1929 = vadd.xlane.f32.xlu0 %v1928_v16 }
 0x602   :  { %v1930_v35 = vpop.xlane.xlu0 %1929 }
 0x603   :  { %v1931_v36 = vmul.f32 0.00390625, %v1930_v35 }
 0x605   :  { %v1932_v38 = vadd.f32 1e-05, %v1931_v36 }
 0x607   :  { %2817 = vrsqrt.f32 %v1932_v38 }
 0x614   :  { %v2818_v41 = vpop.eup %2817 }
 0x615   :  { %v1935_v19 = vmul.f32 %v2818_v41, %v1923_v10  ;;  %v1934_v39 = vmul.f32 %v2818_v41, %v1922_v9 }
 0x617   :  { %v1948_v42 = vmul.f32 %v1944_v40, %v1935_v19  ;;  %v1947_v43 = vmul.f32 %v1940_v59, %v1934_v39 }
 0x619   :  { %v1961_v44 = vadd.f32 %v1957_v31, %v1948_v42  ;;  %v1960_v20 = vadd.f32 %v1953_v30, %v1947_v43 }
 0x61b   :  { %v1963_v45 = vpack.c.bf16 %v1961_v44, %v1961_v44  ;;  %v1962_v61 = vpack.c.bf16 %v1960_v20, %v1960_v20 }
 0x61d   :  { %2131 = vmatprep.mubr.bf16.mxu0 %v1963_v45 }
 0x61e   :  { %2132 = vmatmul.mubr.bf16.vlgmr.msra.gmra.mxu0 %v1962_v61 }
 0x6de   :  { %v2471_v47 = vpop.f32.mrf.mxu0 }
 0x6e0   :  { %v2472_v37 = vpop.f32.mrf.mxu0 }
 0x6e1   :  { %v2473_v49 = vadd.f32 %v2472_v37, %v2471_v47 }
 0x6e2   :  { %v2474_v13 = vpop.f32.mrf.mxu0 }
 0x6e3   :  { %v2134_v1 = vadd.f32 %v2473_v49, %v2433_v48 }
 0x6e4   :  { %v2475_v46 = vpop.f32.mrf.mxu0 }
 0x6e5   :  { %v2139_v4 = vmax.f32 %v2134_v1, 0.0 }
 0x6e7   :  { %v2142_v50 = vsel %vm1914_vm4, %v2139_v4, 0.0 }
 0x6e8   :  { %2143 = vadd.xlane.f32.xlu1 %v2142_v50 }
 0x771   :  { %v2144_v53 = vpop.xlane.xlu1 %2143 }
 0x772   :  { %v2146_v55 = vmul.f32 0.0078125, %v2144_v53 }
 0x774   :  { %v2147_v54 = vsub.f32 %v2139_v4, %v2146_v55 }
 0x776   :  { %v2148_v57 = vmul.f32 %v2147_v54, %v2147_v54 }
 0x778   :  { %v2149_v56 = vsel %vm1914_vm4, %v2148_v57, 0.0 }
 0x779   :  { %2150 = vadd.xlane.f32.xlu0 %v2149_v56 }
 0x802   :  { %v2151_v58 = vpop.xlane.xlu0 %2150 }
 0x803   :  { %v2152_v60 = vmul.f32 0.0078125, %v2151_v58 }
 0x805   :  { %v2153_v63 = vadd.f32 1e-05, %v2152_v60 }
 0x807   :  { %2819 = vrsqrt.f32 %v2153_v63 }
 0x814   :  { %v2820_v0 = vpop.eup %2819 }
 0x815   :  { %v2155_v3 = vmul.f32 %v2820_v0, %v2147_v54 }
 0x817   :  { %v2162_v51 = vmul.f32 %v2450_v2, %v2155_v3 }
 0x819   :  { %v2169_v8 = vadd.f32 %v2451_v5, %v2162_v51 }
 0x81b   :  { %v2187_v9 = vmul.f32 %v2453_v6, %v2169_v8  ;;  %v2175_v10 = vmul.f32 %v2452_v7, %v2169_v8 }
 0x81d   :  { %v2188_v11 = vsel %vm1914_vm4, %v2187_v9, 0.0  ;;  %v2176_v12 = vsel %vm1914_vm4, %v2175_v10, 0.0 }
 0x81e   :  { %2189 = vadd.xlane.f32.xlu1 %v2188_v11  ;;  %2177 = vadd.xlane.f32.xlu0 %v2176_v12 }
 0x8a7   :  { %v2190_v15 = vpop.xlane.xlu1 %2189  ;;  %v2178_v22 = vpop.xlane.xlu0 %2177 }
 0x8a8   :  { %v2193_v16 = vadd.f32 %v2192_v14, %v2190_v15  ;;  %v2181_v23 = vadd.f32 %v2180_v21, %v2178_v22 }
 0x8aa   :  { %v2197_v18 = vmin.f32 %v2193_v16, 20.0  ;;  %v2194_v26 = vmul.f32 1.442695, %v2181_v23  ;;  %vm2196_vm7 = vcmp.gt.f32.partialorder %v2193_v16, 20.0 }
 0x8ac   :  { %v2198_v52 = vmul.f32 1.442695, %v2197_v18 }
 0x8ae   :  { %2821 = vpow2.f32 %v2198_v52 }
 0x8bb   :  { %v2822_v24 = vpop.eup %2821 }
 0x8bc   :  { %v2200_v25 = vadd.f32 1.0, %v2822_v24  ;;  %v2203_v28 = vmul.f32 -0.5, %v2822_v24  ;;  %v2206_v32 = vand.u32 2147483647, %v2822_v24 }
 0x8be   :  { %2823 = vlog2.f32 %v2200_v25  ;;  %v2204_v29 = vadd.f32 1.0, %v2203_v28  ;;  %vm2207_vm5 = vcmp.lt.f32.partialorder %v2206_v32, 0.0004427343 }
 0x8bf   :  { %2825 = vpow2.f32 %v2194_v26 }
 0x8c0   :  { %v2205_v35 = vmul.f32 %v2822_v24, %v2204_v29 }
 0x8cb   :  { %v2824_v33 = vpop.eup %2823 }
 0x8cc   :  { %v2202_v34 = vmul.f32 0.6931472, %v2824_v33  ;;  %v2826_v38 = vpop.eup %2825 }
 0x8ce   :  { %v2208_v36 = vsel %vm2207_vm5, %v2205_v35, %v2202_v34 }
 0x8cf   :  { %v2209_v62 = vsel %vm2196_vm7, %v2193_v16, %v2208_v36 }
 0x8d0   :  { %v2211_v17 = vsel %vm2210_vm6, %v2826_v38, %v2209_v62 }
 0x8d1   :  { %2213 = vst.msk [vmem:[#allocation6] sm:$0x3] %vm2212_vm8, %v2211_v17 }
 0x8d2   :  { %2858 = shalt.err (!%p2855_p9)
}
 0x8d3   :  { %2223 = dma.vmem_to_hbm [thread:$0]  %s2221_s17, 32, %s3786_s16, [#allocation4]  }
 0x8d4   :  { %2869 = dma.done.wait [#allocation4], 32  }
 0x8d5   :  { %2870 = vsyncadd [#allocation4], 4294967264 }
 0x8d6   :  { %2227 = vsyncpa [#allocation4], 1 }
 0x8d7   :  { %2228 = vsyncpa [#allocation5], 1 }

</bundles_post_ra>
